<compile_context>
chip_gen: v5e
topology: v5e:2x2
jax: 0.10.0
libtpu: 0.0.40
codegen_flags: <defaults>
</compile_context>

<pallas_src>
import functools
import math

import jax
import jax.numpy as jnp
from jax.experimental import pallas as pl
from jax.experimental.pallas import tpu as pltpu

LN_EPS = 1e-5
_INV_SQRT2 = 0.7071067811865476


def _round_up(n, m):
    return ((n + m - 1) // m) * m


def _erf(x):
    # Abramowitz & Stegun 7.1.26, |error| <= 1.5e-7.  Only exp / mul / add /
    # compare / select, all guaranteed to lower in Mosaic.
    a1, a2, a3, a4, a5 = (0.254829592, -0.284496736, 1.421413741,
                          -1.453152027, 1.061405429)
    p = 0.3275911
    ax = jnp.abs(x)
    t = 1.0 / (1.0 + p * ax)
    poly = ((((a5 * t + a4) * t + a3) * t + a2) * t + a1) * t
    y = 1.0 - poly * jnp.exp(-ax * ax)
    return jnp.where(x >= 0, y, -y)


def _gelu(x, approx):
    if approx:
        # tanh-approx GELU rides the EUP slot; slight deviation from PyTorch's
        # exact nn.GELU().
        return jax.nn.gelu(x, approximate=True)
    return 0.5 * x * (1.0 + _erf(x * _INV_SQRT2))


def _layernorm(x, gamma, beta):
    # One-pass stats: sum and sum-of-squares are independent reductions (can
    # co-issue on the XLUs); matches PyTorch LayerNorm (biased var, eps inside
    # the rsqrt) to within roundoff.
    n = x.shape[-1]
    s = jnp.sum(x, axis=-1, keepdims=True)
    ss = jnp.sum(x * x, axis=-1, keepdims=True)
    mean = s * (1.0 / n)
    var = jnp.maximum(ss * (1.0 / n) - mean * mean, 0.0)
    inv = jax.lax.rsqrt(var + LN_EPS)
    return (x - mean) * inv * gamma + beta


def _progressive_compressor_kernel(
    R, approx_gelu, compute_dtype,
    x_ref, thr_ref,
    w_cat_ref, b_cat_ref, g_enc_ref, be_enc_ref,
    w_dec_ref, b_dec_ref, g_dec_ref, be_dec_ref,
    w_s2_ref, b_s2_ref,
    out_ref, mask_ref,
):
    x = x_ref[...].astype(jnp.float32)                       # [TM, H]
    xb = x.astype(compute_dtype)                             # matmul precision

    # Fused encoder + scorer-stage-1 matmul (shared LHS, shared K = H): one
    # [TM,H] @ [H, R+H2] MXU pass; split the columns at R afterwards.
    y = jnp.dot(xb, w_cat_ref[...], preferred_element_type=jnp.float32)
    y = y + b_cat_ref[...]
    z_lin = y[:, :R]                                         # encoder pre-LN
    h = _gelu(y[:, R:], approx_gelu)                         # scorer hidden

    # Scorer tail: N=1 matmul stays on the VPU (multiply + lane reduce); the
    # sigmoid is dropped -- compare the logit against logit(threshold).
    logit = jnp.sum(h * w_s2_ref[...], axis=-1, keepdims=True) + b_s2_ref[...]
    keep = logit > thr_ref[...]                              # [TM, 1] bool

    # Encoder: LayerNorm -> GELU.   Decoder: Linear -> LayerNorm.
    z = _gelu(_layernorm(z_lin, g_enc_ref[...], be_enc_ref[...]), approx_gelu)
    r = jnp.dot(z.astype(compute_dtype), w_dec_ref[...],
                preferred_element_type=jnp.float32)
    r = _layernorm(r + b_dec_ref[...], g_dec_ref[...], be_dec_ref[...])

    # Selective blend: keep x where important, reconstruction elsewhere.
    out_ref[...] = jnp.where(keep, x, r).astype(out_ref.dtype)
    mask_ref[...] = keep.astype(mask_ref.dtype)


def progressive_compressor_forward(x, params, *, threshold=0.1, tile_m=256,
                                   compute_dtype=jnp.bfloat16,
                                   approx_gelu=False):
    """x: [B, S, H] float32.  Returns (x_filtered [B,S,H], mask [B,S,1])."""
    B, S, H = x.shape
    M = B * S
    x2 = x.reshape(M, H)

    R = params["w_enc"].shape[1]
    H2 = params["w_s1"].shape[1]
    N_cat = R + H2

    # --- logit-space threshold (sigmoid removed from the kernel) ---
    t = float(threshold)
    if t <= 0.0:
        thr_logit = -float("inf")      # sigmoid(.) > t is always true
    elif t >= 1.0:
        thr_logit = float("inf")       # sigmoid(.) > t is always false
    else:
        thr_logit = math.log(t / (1.0 - t))
    thr = jnp.full((1, 1), thr_logit, jnp.float32)

    # --- weight prep: fuse the two K=H matmuls, cast matmul weights ---
    w_item = jnp.dtype(compute_dtype).itemsize
    w_cat = jnp.concatenate([params["w_enc"], params["w_s1"]],
                            axis=1).astype(compute_dtype)            # [H, R+H2]
    b_cat = jnp.concatenate([params["b_enc"], params["b_s1"]], axis=1)
    w_dec = params["w_dec"].astype(compute_dtype)                    # [R, H]
    w_s2_row = params["w_s2"].reshape(1, H2).astype(jnp.float32)     # VPU path

    # --- row tile: multiple of 8, clamped, and >= 2 grid steps so a v7x
    #     megacore can shard rows across both TensorCores ---
    tm0 = _round_up(max(8, min(int(tile_m), M)), 8)
    if M > 8:
        tm0 = min(tm0, _round_up(pl.cdiv(M, 2), 8))
    tm0 = max(tm0, 8)

    # --- generation-aware VMEM ceiling (v5e/v6e: 128 MiB, v7x: 64 MiB/TC) ---
    vmem_cap = 128 << 20
    try:
        vmem_cap = int(getattr(pltpu.get_tpu_info(), "vmem_capacity_bytes",
                               vmem_cap))
    except Exception:
        pass
    vmem_ceiling = max(16 << 20, vmem_cap - (8 << 20))

    def vmem_needed(tm_, weight_bufs):
        weights = weight_bufs * (
            (H * N_cat + R * H) * w_item
            + (N_cat + 2 * R + 3 * H + H2 + 2) * 4)
        io = 2 * tm_ * H * 4 + 2 * (tm_ * H * 4 + tm_ * 4)   # double-buffered
        work = 5 * tm_ * max(H, N_cat) * 4                   # intermediates
        return weights + io + work + (2 << 20)

    out_shapes = (
        jax.ShapeDtypeStruct((M, H), jnp.float32),
        jax.ShapeDtypeStruct((M, 1), jnp.float32),
    )
    args = (x2, thr,
            w_cat, b_cat, params["g_enc"], params["be_enc"],
            w_dec, params["b_dec"], params["g_dec"], params["be_dec"],
            w_s2_row, params["b_s2"])
    kernel = functools.partial(_progressive_compressor_kernel, R, approx_gelu,
                               compute_dtype)

    def run(weight_bufs):
        # Shrink the row tile until the resident plan fits this chip's VMEM.
        tm_ = tm0
        while tm_ > 8 and vmem_needed(tm_, weight_bufs) > vmem_ceiling:
            tm_ = max(8, _round_up(tm_ // 2, 8))
        # TODO(synk): if the resident weights alone exceed the ceiling (large H
        # on v7x), switch to a K-tiled variant instead of letting it spill.
        needed = vmem_needed(tm_, weight_bufs)
        vmem_limit = int(min(vmem_ceiling, max(needed, 32 << 20)))
        grid = (pl.cdiv(M, tm_),)

        def const_spec(shape):
            # Grid-constant operand: resident in VMEM; single-buffered when
            # supported so the pipeline does not duplicate it.
            if weight_bufs == 1:
                return pl.BlockSpec(shape, lambda i: (0, 0),
                                    pipeline_mode=pl.Buffered(1))
            return pl.BlockSpec(shape, lambda i: (0, 0))

        flops = 2 * M * (H * N_cat + R * H) + 2 * M * H2 + 16 * M * (R + H)
        transcendentals = M * (R + H2)
        bytes_accessed = ((2 * M * H + M) * 4
                          + (H * N_cat + R * H) * w_item
                          + (N_cat + 2 * R + 3 * H + H2 + 2) * 4)
        cost = pl.CostEstimate(flops=int(flops),
                               transcendentals=int(transcendentals),
                               bytes_accessed=int(bytes_accessed))

        return pl.pallas_call(
            kernel,
            out_shape=out_shapes,
            grid_spec=pltpu.PrefetchScalarGridSpec(
                num_scalar_prefetch=0,
                grid=grid,
                in_specs=[
                    pl.BlockSpec((tm_, H), lambda i: (i, 0)),   # x rows
                    const_spec((1, 1)),                         # logit(thr)
                    const_spec((H, N_cat)), const_spec((1, N_cat)),
                    const_spec((1, R)), const_spec((1, R)),
                    const_spec((R, H)), const_spec((1, H)),
                    const_spec((1, H)), const_spec((1, H)),
                    const_spec((1, H2)), const_spec((1, 1)),
                ],
                out_specs=[
                    pl.BlockSpec((tm_, H), lambda i: (i, 0)),
                    pl.BlockSpec((tm_, 1), lambda i: (i, 0)),
                ],
            ),
            compiler_params=pltpu.CompilerParams(
                dimension_semantics=("parallel",),
                vmem_limit_bytes=vmem_limit),
            cost_estimate=cost,
        )(*args)

    try:
        out, mask = run(1)     # single-buffered resident weights
    except Exception:
        # TODO(synk): drop this fallback once pl.Buffered(1) single-buffering
        # is confirmed available on all deployed jax versions.
        out, mask = run(2)

    return out.reshape(B, S, H), mask.reshape(B, S, 1)


def init_params(key, hidden_size, compression_ratio=0.5):
    H = hidden_size
    R = int(H * compression_ratio)
    H2 = H // 2
    ks = jax.random.split(key, 4)
    scale = 0.02
    return {
        # encoder: Linear(H, R) + LayerNorm(R)
        "w_enc": scale * jax.random.normal(ks[0], (H, R), jnp.float32),
        "b_enc": jnp.zeros((1, R), jnp.float32),
        "g_enc": jnp.ones((1, R), jnp.float32),
        "be_enc": jnp.zeros((1, R), jnp.float32),
        # decoder: Linear(R, H) + LayerNorm(H)
        "w_dec": scale * jax.random.normal(ks[1], (R, H), jnp.float32),
        "b_dec": jnp.zeros((1, H), jnp.float32),
        "g_dec": jnp.ones((1, H), jnp.float32),
        "be_dec": jnp.zeros((1, H), jnp.float32),
        # scorer: Linear(H, H//2) -> GELU -> Linear(H//2, 1) -> Sigmoid
        "w_s1": scale * jax.random.normal(ks[2], (H, H2), jnp.float32),
        "b_s1": jnp.zeros((1, H2), jnp.float32),
        "w_s2": scale * jax.random.normal(ks[3], (H2, 1), jnp.float32),
        "b_s2": 0.1 * jnp.ones((1, 1), jnp.float32),
    }


def reference_forward(x, params, threshold=0.1):
    """Pure-JAX f32 reference of the PyTorch forward (high-precision matmuls,
    two-pass LayerNorm, exact erf GELU)."""
    pp = jax.lax.Precision.HIGHEST

    def ln(v, g, b):
        mean = jnp.mean(v, axis=-1, keepdims=True)
        var = jnp.mean((v - mean) ** 2, axis=-1, keepdims=True)
        return (v - mean) * jax.lax.rsqrt(var + LN_EPS) * g + b

    h = jax.nn.gelu(jnp.dot(x, params["w_s1"], precision=pp) + params["b_s1"],
                    approximate=False)
    imp = jax.nn.sigmoid(jnp.dot(h, params["w_s2"], precision=pp)
                         + params["b_s2"])
    mask = (imp > threshold).astype(jnp.float32)
    z = jax.nn.gelu(ln(jnp.dot(x, params["w_enc"], precision=pp)
                       + params["b_enc"], params["g_enc"], params["be_enc"]),
                    approximate=False)
    r = ln(jnp.dot(z, params["w_dec"], precision=pp) + params["b_dec"],
           params["g_dec"], params["be_dec"])
    return x * mask + r * (1.0 - mask), mask


if __name__ == "__main__":
    key = jax.random.PRNGKey(0)
    k_x, k_p = jax.random.split(key)

    B, S, H = 2, 8, 32          # hidden_size=32, compression_ratio=0.5 -> R=16
    x = jax.random.normal(k_x, (B, S, H), jnp.float32)
    params = init_params(k_p, H, compression_ratio=0.5)

    # --- f32 matmul path, low threshold: mask=1 everywhere (pass-through) ---
    out_a, mask_a = progressive_compressor_forward(
        x, params, threshold=0.1, compute_dtype=jnp.float32)
    jax.block_until_ready((out_a, mask_a))
    ref_a, ref_mask_a = reference_forward(x, params, 0.1)
    assert out_a.shape == (B, S, H) and mask_a.shape == (B, S, 1)
    assert jnp.array_equal(mask_a, ref_mask_a)
    assert jnp.allclose(out_a, ref_a, atol=5e-3, rtol=5e-3)

    # --- f32 matmul path, high threshold: mask=0 -> reconstruction branch ---
    out_b, mask_b = progressive_compressor_forward(
        x, params, threshold=0.9, compute_dtype=jnp.float32)
    jax.block_until_ready((out_b, mask_b))
    ref_b, ref_mask_b = reference_forward(x, params, 0.9)
    assert jnp.array_equal(mask_b, ref_mask_b)
    assert jnp.allclose(out_b, ref_b, atol=5e-3, rtol=5e-3)

    # --- default bf16 matmul path (looser numeric tolerance) ---
    out_c, mask_c = progressive_compressor_forward(
        x, params, threshold=0.9, compute_dtype=jnp.bfloat16)
    jax.block_until_ready((out_c, mask_c))
    assert jnp.array_equal(mask_c, ref_mask_b)
    assert jnp.allclose(out_c, ref_b, atol=1e-1, rtol=1e-1)

    print("KERNEL_OK")
</pallas_src>

<mosaic_0001>
module attributes {stable_mosaic.version = 11 : i64} {
  func.func @_progressive_compressor_kernel(%arg0: i32, %arg1: memref<8x32xf32, #tpu.memory_space<vmem>>, %arg2: memref<1x1xf32, #tpu.memory_space<vmem>>, %arg3: memref<32x32xf32, #tpu.memory_space<vmem>>, %arg4: memref<1x32xf32, #tpu.memory_space<vmem>>, %arg5: memref<1x16xf32, #tpu.memory_space<vmem>>, %arg6: memref<1x16xf32, #tpu.memory_space<vmem>>, %arg7: memref<16x32xf32, #tpu.memory_space<vmem>>, %arg8: memref<1x32xf32, #tpu.memory_space<vmem>>, %arg9: memref<1x32xf32, #tpu.memory_space<vmem>>, %arg10: memref<1x32xf32, #tpu.memory_space<vmem>>, %arg11: memref<1x16xf32, #tpu.memory_space<vmem>>, %arg12: memref<1x1xf32, #tpu.memory_space<vmem>>, %arg13: memref<8x32xf32, #tpu.memory_space<vmem>>, %arg14: memref<8x1xf32, #tpu.memory_space<vmem>>) attributes {dimension_semantics = [#tpu.dimension_semantics<parallel>], iteration_bounds = array<i64: 2>, scalar_prefetch = 0 : i64, scratch_operands = 0 : i64, tpu.core_type = #tpu.core_type<tc>, window_params = [{transform_indices = @transform_0, window_bounds = array<i64: 8, 32>}, {pipeline_mode = #tpu.pipeline_mode<synchronous>, transform_indices = @transform_1, window_bounds = array<i64: 1, 1>}, {pipeline_mode = #tpu.pipeline_mode<synchronous>, transform_indices = @transform_2, window_bounds = array<i64: 32, 32>}, {pipeline_mode = #tpu.pipeline_mode<synchronous>, transform_indices = @transform_3, window_bounds = array<i64: 1, 32>}, {pipeline_mode = #tpu.pipeline_mode<synchronous>, transform_indices = @transform_4, window_bounds = array<i64: 1, 16>}, {pipeline_mode = #tpu.pipeline_mode<synchronous>, transform_indices = @transform_5, window_bounds = array<i64: 1, 16>}, {pipeline_mode = #tpu.pipeline_mode<synchronous>, transform_indices = @transform_6, window_bounds = array<i64: 16, 32>}, {pipeline_mode = #tpu.pipeline_mode<synchronous>, transform_indices = @transform_7, window_bounds = array<i64: 1, 32>}, {pipeline_mode = #tpu.pipeline_mode<synchronous>, transform_indices = @transform_8, window_bounds = array<i64: 1, 32>}, {pipeline_mode = #tpu.pipeline_mode<synchronous>, transform_indices = @transform_9, window_bounds = array<i64: 1, 32>}, {pipeline_mode = #tpu.pipeline_mode<synchronous>, transform_indices = @transform_10, window_bounds = array<i64: 1, 16>}, {pipeline_mode = #tpu.pipeline_mode<synchronous>, transform_indices = @transform_11, window_bounds = array<i64: 1, 1>}, {transform_indices = @transform_12, window_bounds = array<i64: 8, 32>}, {transform_indices = @transform_13, window_bounds = array<i64: 8, 1>}]} {
    %c0 = arith.constant 0 : index
    %c0_0 = arith.constant 0 : index
    %0 = vector.load %arg1[%c0, %c0_0] : memref<8x32xf32, #tpu.memory_space<vmem>>, vector<8x32xf32>
    %c0_1 = arith.constant 0 : index
    %c0_2 = arith.constant 0 : index
    %1 = vector.load %arg3[%c0_1, %c0_2] : memref<32x32xf32, #tpu.memory_space<vmem>>, vector<32x32xf32>
    %cst = arith.constant dense<0.000000e+00> : vector<8x32xf32>
    %2 = tpu.matmul %0, %1, %cst {dimension_numbers = #tpu.dot_dimension_numbers<[1], [0], [0], [1], [0, 0, 1, 1], [], []>} : vector<8x32xf32>, vector<32x32xf32>, vector<8x32xf32> -> vector<8x32xf32>
    %c0_3 = arith.constant 0 : index
    %c0_4 = arith.constant 0 : index
    %3 = vector.load %arg4[%c0_3, %c0_4] : memref<1x32xf32, #tpu.memory_space<vmem>>, vector<1x32xf32>
    %4 = vector.broadcast %3 : vector<1x32xf32> to vector<8x32xf32>
    %5 = arith.addf %2, %4 : vector<8x32xf32>
    %6 = vector.extract_strided_slice %5 {offsets = [0, 0], sizes = [8, 16], strides = [1, 1]} : vector<8x32xf32> to vector<8x16xf32>
    %7 = vector.extract_strided_slice %5 {offsets = [0, 16], sizes = [8, 16], strides = [1, 1]} : vector<8x32xf32> to vector<8x16xf32>
    %cst_5 = arith.constant 5.000000e-01 : f32
    %8 = vector.broadcast %cst_5 : f32 to vector<8x16xf32>
    %9 = arith.mulf %8, %7 : vector<8x16xf32>
    %cst_6 = arith.constant 0.707106769 : f32
    %10 = vector.broadcast %cst_6 : f32 to vector<8x16xf32>
    %11 = arith.mulf %7, %10 : vector<8x16xf32>
    %12 = math.absf %11 : vector<8x16xf32>
    %cst_7 = arith.constant 0.327591091 : f32
    %13 = vector.broadcast %cst_7 : f32 to vector<8x16xf32>
    %14 = arith.mulf %13, %12 : vector<8x16xf32>
    %cst_8 = arith.constant 1.000000e+00 : f32
    %15 = vector.broadcast %cst_8 : f32 to vector<8x16xf32>
    %16 = arith.addf %15, %14 : vector<8x16xf32>
    %cst_9 = arith.constant 1.000000e+00 : f32
    %17 = vector.broadcast %cst_9 : f32 to vector<8x16xf32>
    %18 = arith.divf %17, %16 : vector<8x16xf32>
    %cst_10 = arith.constant 1.06140542 : f32
    %19 = vector.broadcast %cst_10 : f32 to vector<8x16xf32>
    %20 = arith.mulf %19, %18 : vector<8x16xf32>
    %cst_11 = arith.constant -1.45315206 : f32
    %21 = vector.broadcast %cst_11 : f32 to vector<8x16xf32>
    %22 = arith.addf %20, %21 : vector<8x16xf32>
    %23 = arith.mulf %22, %18 : vector<8x16xf32>
    %cst_12 = arith.constant 1.42141378 : f32
    %24 = vector.broadcast %cst_12 : f32 to vector<8x16xf32>
    %25 = arith.addf %23, %24 : vector<8x16xf32>
    %26 = arith.mulf %25, %18 : vector<8x16xf32>
    %cst_13 = arith.constant -0.284496725 : f32
    %27 = vector.broadcast %cst_13 : f32 to vector<8x16xf32>
    %28 = arith.addf %26, %27 : vector<8x16xf32>
    %29 = arith.mulf %28, %18 : vector<8x16xf32>
    %cst_14 = arith.constant 0.254829586 : f32
    %30 = vector.broadcast %cst_14 : f32 to vector<8x16xf32>
    %31 = arith.addf %29, %30 : vector<8x16xf32>
    %32 = arith.mulf %31, %18 : vector<8x16xf32>
    %cst_15 = arith.constant 0.000000e+00 : f32
    %33 = vector.broadcast %cst_15 : f32 to vector<8x16xf32>
    %34 = arith.subf %33, %12 : vector<8x16xf32>
    %35 = arith.mulf %34, %12 : vector<8x16xf32>
    %36 = math.exp %35 : vector<8x16xf32>
    %37 = arith.mulf %32, %36 : vector<8x16xf32>
    %cst_16 = arith.constant 1.000000e+00 : f32
    %38 = vector.broadcast %cst_16 : f32 to vector<8x16xf32>
    %39 = arith.subf %38, %37 : vector<8x16xf32>
    %cst_17 = arith.constant 0.000000e+00 : f32
    %40 = vector.broadcast %cst_17 : f32 to vector<8x16xf32>
    %41 = arith.cmpf oge, %11, %40 : vector<8x16xf32>
    %cst_18 = arith.constant 0.000000e+00 : f32
    %42 = vector.broadcast %cst_18 : f32 to vector<8x16xf32>
    %43 = arith.subf %42, %39 : vector<8x16xf32>
    %44 = arith.select %41, %39, %43 : vector<8x16xi1>, vector<8x16xf32>
    %cst_19 = arith.constant 1.000000e+00 : f32
    %45 = vector.broadcast %cst_19 : f32 to vector<8x16xf32>
    %46 = arith.addf %45, %44 : vector<8x16xf32>
    %47 = arith.mulf %9, %46 : vector<8x16xf32>
    %c0_20 = arith.constant 0 : index
    %c0_21 = arith.constant 0 : index
    %48 = vector.load %arg11[%c0_20, %c0_21] : memref<1x16xf32, #tpu.memory_space<vmem>>, vector<1x16xf32>
    %49 = vector.broadcast %48 : vector<1x16xf32> to vector<8x16xf32>
    %50 = arith.mulf %47, %49 : vector<8x16xf32>
    %cst_22 = arith.constant dense<0.000000e+00> : vector<8xf32>
    %51 = vector.multi_reduction <add>, %50, %cst_22 [1] : vector<8x16xf32> to vector<8xf32>
    %52 = vector.shape_cast %51 : vector<8xf32> to vector<8x1xf32>
    %c0_23 = arith.constant 0 : index
    %c0_24 = arith.constant 0 : index
    %53 = vector.load %arg12[%c0_23, %c0_24] : memref<1x1xf32, #tpu.memory_space<vmem>>, vector<1x1xf32>
    %54 = vector.broadcast %53 : vector<1x1xf32> to vector<8x1xf32>
    %55 = arith.addf %52, %54 : vector<8x1xf32>
    %c0_25 = arith.constant 0 : index
    %c0_26 = arith.constant 0 : index
    %56 = vector.load %arg2[%c0_25, %c0_26] : memref<1x1xf32, #tpu.memory_space<vmem>>, vector<1x1xf32>
    %57 = vector.broadcast %56 : vector<1x1xf32> to vector<8x1xf32>
    %58 = arith.cmpf ogt, %55, %57 : vector<8x1xf32>
    %c0_27 = arith.constant 0 : index
    %c0_28 = arith.constant 0 : index
    %59 = vector.load %arg5[%c0_27, %c0_28] : memref<1x16xf32, #tpu.memory_space<vmem>>, vector<1x16xf32>
    %c0_29 = arith.constant 0 : index
    %c0_30 = arith.constant 0 : index
    %60 = vector.load %arg6[%c0_29, %c0_30] : memref<1x16xf32, #tpu.memory_space<vmem>>, vector<1x16xf32>
    %cst_31 = arith.constant dense<0.000000e+00> : vector<8xf32>
    %61 = vector.multi_reduction <add>, %6, %cst_31 [1] : vector<8x16xf32> to vector<8xf32>
    %62 = vector.shape_cast %61 : vector<8xf32> to vector<8x1xf32>
    %63 = arith.mulf %6, %6 : vector<8x16xf32>
    %cst_32 = arith.constant dense<0.000000e+00> : vector<8xf32>
    %64 = vector.multi_reduction <add>, %63, %cst_32 [1] : vector<8x16xf32> to vector<8xf32>
    %65 = vector.shape_cast %64 : vector<8xf32> to vector<8x1xf32>
    %cst_33 = arith.constant 6.250000e-02 : f32
    %66 = vector.broadcast %cst_33 : f32 to vector<8x1xf32>
    %67 = arith.mulf %62, %66 : vector<8x1xf32>
    %cst_34 = arith.constant 6.250000e-02 : f32
    %68 = vector.broadcast %cst_34 : f32 to vector<8x1xf32>
    %69 = arith.mulf %65, %68 : vector<8x1xf32>
    %70 = arith.mulf %67, %67 : vector<8x1xf32>
    %71 = arith.subf %69, %70 : vector<8x1xf32>
    %cst_35 = arith.constant 0.000000e+00 : f32
    %72 = vector.broadcast %cst_35 : f32 to vector<8x1xf32>
    %73 = arith.maximumf %71, %72 : vector<8x1xf32>
    %cst_36 = arith.constant 9.99999974E-6 : f32
    %74 = vector.broadcast %cst_36 : f32 to vector<8x1xf32>
    %75 = arith.addf %73, %74 : vector<8x1xf32>
    %76 = math.rsqrt %75 : vector<8x1xf32>
    %77 = vector.broadcast %67 : vector<8x1xf32> to vector<8x16xf32>
    %78 = arith.subf %6, %77 : vector<8x16xf32>
    %79 = vector.broadcast %76 : vector<8x1xf32> to vector<8x16xf32>
    %80 = arith.mulf %78, %79 : vector<8x16xf32>
    %81 = vector.broadcast %59 : vector<1x16xf32> to vector<8x16xf32>
    %82 = arith.mulf %80, %81 : vector<8x16xf32>
    %83 = vector.broadcast %60 : vector<1x16xf32> to vector<8x16xf32>
    %84 = arith.addf %82, %83 : vector<8x16xf32>
    %cst_37 = arith.constant 5.000000e-01 : f32
    %85 = vector.broadcast %cst_37 : f32 to vector<8x16xf32>
    %86 = arith.mulf %85, %84 : vector<8x16xf32>
    %cst_38 = arith.constant 0.707106769 : f32
    %87 = vector.broadcast %cst_38 : f32 to vector<8x16xf32>
    %88 = arith.mulf %84, %87 : vector<8x16xf32>
    %89 = math.absf %88 : vector<8x16xf32>
    %cst_39 = arith.constant 0.327591091 : f32
    %90 = vector.broadcast %cst_39 : f32 to vector<8x16xf32>
    %91 = arith.mulf %90, %89 : vector<8x16xf32>
    %cst_40 = arith.constant 1.000000e+00 : f32
    %92 = vector.broadcast %cst_40 : f32 to vector<8x16xf32>
    %93 = arith.addf %92, %91 : vector<8x16xf32>
    %cst_41 = arith.constant 1.000000e+00 : f32
    %94 = vector.broadcast %cst_41 : f32 to vector<8x16xf32>
    %95 = arith.divf %94, %93 : vector<8x16xf32>
    %cst_42 = arith.constant 1.06140542 : f32
    %96 = vector.broadcast %cst_42 : f32 to vector<8x16xf32>
    %97 = arith.mulf %96, %95 : vector<8x16xf32>
    %cst_43 = arith.constant -1.45315206 : f32
    %98 = vector.broadcast %cst_43 : f32 to vector<8x16xf32>
    %99 = arith.addf %97, %98 : vector<8x16xf32>
    %100 = arith.mulf %99, %95 : vector<8x16xf32>
    %cst_44 = arith.constant 1.42141378 : f32
    %101 = vector.broadcast %cst_44 : f32 to vector<8x16xf32>
    %102 = arith.addf %100, %101 : vector<8x16xf32>
    %103 = arith.mulf %102, %95 : vector<8x16xf32>
    %cst_45 = arith.constant -0.284496725 : f32
    %104 = vector.broadcast %cst_45 : f32 to vector<8x16xf32>
    %105 = arith.addf %103, %104 : vector<8x16xf32>
    %106 = arith.mulf %105, %95 : vector<8x16xf32>
    %cst_46 = arith.constant 0.254829586 : f32
    %107 = vector.broadcast %cst_46 : f32 to vector<8x16xf32>
    %108 = arith.addf %106, %107 : vector<8x16xf32>
    %109 = arith.mulf %108, %95 : vector<8x16xf32>
    %cst_47 = arith.constant 0.000000e+00 : f32
    %110 = vector.broadcast %cst_47 : f32 to vector<8x16xf32>
    %111 = arith.subf %110, %89 : vector<8x16xf32>
    %112 = arith.mulf %111, %89 : vector<8x16xf32>
    %113 = math.exp %112 : vector<8x16xf32>
    %114 = arith.mulf %109, %113 : vector<8x16xf32>
    %cst_48 = arith.constant 1.000000e+00 : f32
    %115 = vector.broadcast %cst_48 : f32 to vector<8x16xf32>
    %116 = arith.subf %115, %114 : vector<8x16xf32>
    %cst_49 = arith.constant 0.000000e+00 : f32
    %117 = vector.broadcast %cst_49 : f32 to vector<8x16xf32>
    %118 = arith.cmpf oge, %88, %117 : vector<8x16xf32>
    %cst_50 = arith.constant 0.000000e+00 : f32
    %119 = vector.broadcast %cst_50 : f32 to vector<8x16xf32>
    %120 = arith.subf %119, %116 : vector<8x16xf32>
    %121 = arith.select %118, %116, %120 : vector<8x16xi1>, vector<8x16xf32>
    %cst_51 = arith.constant 1.000000e+00 : f32
    %122 = vector.broadcast %cst_51 : f32 to vector<8x16xf32>
    %123 = arith.addf %122, %121 : vector<8x16xf32>
    %124 = arith.mulf %86, %123 : vector<8x16xf32>
    %c0_52 = arith.constant 0 : index
    %c0_53 = arith.constant 0 : index
    %125 = vector.load %arg7[%c0_52, %c0_53] : memref<16x32xf32, #tpu.memory_space<vmem>>, vector<16x32xf32>
    %cst_54 = arith.constant dense<0.000000e+00> : vector<8x32xf32>
    %126 = tpu.matmul %124, %125, %cst_54 {dimension_numbers = #tpu.dot_dimension_numbers<[1], [0], [0], [1], [0, 0, 1, 1], [], []>} : vector<8x16xf32>, vector<16x32xf32>, vector<8x32xf32> -> vector<8x32xf32>
    %c0_55 = arith.constant 0 : index
    %c0_56 = arith.constant 0 : index
    %127 = vector.load %arg8[%c0_55, %c0_56] : memref<1x32xf32, #tpu.memory_space<vmem>>, vector<1x32xf32>
    %128 = vector.broadcast %127 : vector<1x32xf32> to vector<8x32xf32>
    %129 = arith.addf %126, %128 : vector<8x32xf32>
    %c0_57 = arith.constant 0 : index
    %c0_58 = arith.constant 0 : index
    %130 = vector.load %arg9[%c0_57, %c0_58] : memref<1x32xf32, #tpu.memory_space<vmem>>, vector<1x32xf32>
    %c0_59 = arith.constant 0 : index
    %c0_60 = arith.constant 0 : index
    %131 = vector.load %arg10[%c0_59, %c0_60] : memref<1x32xf32, #tpu.memory_space<vmem>>, vector<1x32xf32>
    %cst_61 = arith.constant dense<0.000000e+00> : vector<8xf32>
    %132 = vector.multi_reduction <add>, %129, %cst_61 [1] : vector<8x32xf32> to vector<8xf32>
    %133 = vector.shape_cast %132 : vector<8xf32> to vector<8x1xf32>
    %134 = arith.mulf %129, %129 : vector<8x32xf32>
    %cst_62 = arith.constant dense<0.000000e+00> : vector<8xf32>
    %135 = vector.multi_reduction <add>, %134, %cst_62 [1] : vector<8x32xf32> to vector<8xf32>
    %136 = vector.shape_cast %135 : vector<8xf32> to vector<8x1xf32>
    %cst_63 = arith.constant 3.125000e-02 : f32
    %137 = vector.broadcast %cst_63 : f32 to vector<8x1xf32>
    %138 = arith.mulf %133, %137 : vector<8x1xf32>
    %cst_64 = arith.constant 3.125000e-02 : f32
    %139 = vector.broadcast %cst_64 : f32 to vector<8x1xf32>
    %140 = arith.mulf %136, %139 : vector<8x1xf32>
    %141 = arith.mulf %138, %138 : vector<8x1xf32>
    %142 = arith.subf %140, %141 : vector<8x1xf32>
    %cst_65 = arith.constant 0.000000e+00 : f32
    %143 = vector.broadcast %cst_65 : f32 to vector<8x1xf32>
    %144 = arith.maximumf %142, %143 : vector<8x1xf32>
    %cst_66 = arith.constant 9.99999974E-6 : f32
    %145 = vector.broadcast %cst_66 : f32 to vector<8x1xf32>
    %146 = arith.addf %144, %145 : vector<8x1xf32>
    %147 = math.rsqrt %146 : vector<8x1xf32>
    %148 = vector.broadcast %138 : vector<8x1xf32> to vector<8x32xf32>
    %149 = arith.subf %129, %148 : vector<8x32xf32>
    %150 = vector.broadcast %147 : vector<8x1xf32> to vector<8x32xf32>
    %151 = arith.mulf %149, %150 : vector<8x32xf32>
    %152 = vector.broadcast %130 : vector<1x32xf32> to vector<8x32xf32>
    %153 = arith.mulf %151, %152 : vector<8x32xf32>
    %154 = vector.broadcast %131 : vector<1x32xf32> to vector<8x32xf32>
    %155 = arith.addf %153, %154 : vector<8x32xf32>
    %156 = vector.shape_cast %58 : vector<8x1xi1> to vector<8x1xi1>
    %157 = vector.broadcast %156 : vector<8x1xi1> to vector<8x32xi1>
    %158 = arith.select %157, %0, %155 : vector<8x32xi1>, vector<8x32xf32>
    %c0_67 = arith.constant 0 : index
    %c0_68 = arith.constant 0 : index
    %159 = vector.load %arg13[%c0_67, %c0_68] : memref<8x32xf32, #tpu.memory_space<vmem>>, vector<8x32xf32>
    tpu.vector_store %arg13[%c0_67, %c0_68], %158 {strides = array<i32>} : memref<8x32xf32, #tpu.memory_space<vmem>>, vector<8x32xf32>,
    %160 = arith.extui %58 : vector<8x1xi1> to vector<8x1xi32>
    %161 = arith.sitofp %160 : vector<8x1xi32> to vector<8x1xf32>
    %c0_69 = arith.constant 0 : index
    %c0_70 = arith.constant 0 : index
    %162 = vector.load %arg14[%c0_69, %c0_70] : memref<8x1xf32, #tpu.memory_space<vmem>>, vector<8x1xf32>
    tpu.vector_store %arg14[%c0_69, %c0_70], %161 {strides = array<i32>} : memref<8x1xf32, #tpu.memory_space<vmem>>, vector<8x1xf32>,
    return
  }
  func.func @transform_0(%arg0: i32) -> (i32, i32) {
    %c0_i32 = arith.constant 0 : i32
    %c0_i32_0 = arith.constant 0 : i32
    return %arg0, %c0_i32 : i32, i32
  }
  func.func @transform_1(%arg0: i32) -> (i32, i32) {
    %c0_i32 = arith.constant 0 : i32
    %c0_i32_0 = arith.constant 0 : i32
    %c0_i32_1 = arith.constant 0 : i32
    return %c0_i32, %c0_i32_0 : i32, i32
  }
  func.func @transform_2(%arg0: i32) -> (i32, i32) {
    %c0_i32 = arith.constant 0 : i32
    %c0_i32_0 = arith.constant 0 : i32
    %c0_i32_1 = arith.constant 0 : i32
    return %c0_i32, %c0_i32_0 : i32, i32
  }
  func.func @transform_3(%arg0: i32) -> (i32, i32) {
    %c0_i32 = arith.constant 0 : i32
    %c0_i32_0 = arith.constant 0 : i32
    %c0_i32_1 = arith.constant 0 : i32
    return %c0_i32, %c0_i32_0 : i32, i32
  }
  func.func @transform_4(%arg0: i32) -> (i32, i32) {
    %c0_i32 = arith.constant 0 : i32
    %c0_i32_0 = arith.constant 0 : i32
    %c0_i32_1 = arith.constant 0 : i32
    return %c0_i32, %c0_i32_0 : i32, i32
  }
  func.func @transform_5(%arg0: i32) -> (i32, i32) {
    %c0_i32 = arith.constant 0 : i32
    %c0_i32_0 = arith.constant 0 : i32
    %c0_i32_1 = arith.constant 0 : i32
    return %c0_i32, %c0_i32_0 : i32, i32
  }
  func.func @transform_6(%arg0: i32) -> (i32, i32) {
    %c0_i32 = arith.constant 0 : i32
    %c0_i32_0 = arith.constant 0 : i32
    %c0_i32_1 = arith.constant 0 : i32
    return %c0_i32, %c0_i32_0 : i32, i32
  }
  func.func @transform_7(%arg0: i32) -> (i32, i32) {
    %c0_i32 = arith.constant 0 : i32
    %c0_i32_0 = arith.constant 0 : i32
    %c0_i32_1 = arith.constant 0 : i32
    return %c0_i32, %c0_i32_0 : i32, i32
  }
  func.func @transform_8(%arg0: i32) -> (i32, i32) {
    %c0_i32 = arith.constant 0 : i32
    %c0_i32_0 = arith.constant 0 : i32
    %c0_i32_1 = arith.constant 0 : i32
    return %c0_i32, %c0_i32_0 : i32, i32
  }
  func.func @transform_9(%arg0: i32) -> (i32, i32) {
    %c0_i32 = arith.constant 0 : i32
    %c0_i32_0 = arith.constant 0 : i32
    %c0_i32_1 = arith.constant 0 : i32
    return %c0_i32, %c0_i32_0 : i32, i32
  }
  func.func @transform_10(%arg0: i32) -> (i32, i32) {
    %c0_i32 = arith.constant 0 : i32
    %c0_i32_0 = arith.constant 0 : i32
    %c0_i32_1 = arith.constant 0 : i32
    return %c0_i32, %c0_i32_0 : i32, i32
  }
  func.func @transform_11(%arg0: i32) -> (i32, i32) {
    %c0_i32 = arith.constant 0 : i32
    %c0_i32_0 = arith.constant 0 : i32
    %c0_i32_1 = arith.constant 0 : i32
    return %c0_i32, %c0_i32_0 : i32, i32
  }
  func.func @transform_12(%arg0: i32) -> (i32, i32) {
    %c0_i32 = arith.constant 0 : i32
    %c0_i32_0 = arith.constant 0 : i32
    return %arg0, %c0_i32 : i32, i32
  }
  func.func @transform_13(%arg0: i32) -> (i32, i32) {
    %c0_i32 = arith.constant 0 : i32
    %c0_i32_0 = arith.constant 0 : i32
    return %arg0, %c0_i32 : i32, i32
  }
}

module attributes {stable_mosaic.version = 11 : i64} {
  func.func @_progressive_compressor_kernel(%arg0: i32, %arg1: memref<8x32xf32, #tpu.memory_space<vmem>>, %arg2: memref<1x1xf32, #tpu.memory_space<vmem>>, %arg3: memref<32x32xf32, #tpu.memory_space<vmem>>, %arg4: memref<1x32xf32, #tpu.memory_space<vmem>>, %arg5: memref<1x16xf32, #tpu.memory_space<vmem>>, %arg6: memref<1x16xf32, #tpu.memory_space<vmem>>, %arg7: memref<16x32xf32, #tpu.memory_space<vmem>>, %arg8: memref<1x32xf32, #tpu.memory_space<vmem>>, %arg9: memref<1x32xf32, #tpu.memory_space<vmem>>, %arg10: memref<1x32xf32, #tpu.memory_space<vmem>>, %arg11: memref<1x16xf32, #tpu.memory_space<vmem>>, %arg12: memref<1x1xf32, #tpu.memory_space<vmem>>, %arg13: memref<8x32xf32, #tpu.memory_space<vmem>>, %arg14: memref<8x1xf32, #tpu.memory_space<vmem>>) attributes {dimension_semantics = [#tpu.dimension_semantics<parallel>], iteration_bounds = array<i64: 2>, scalar_prefetch = 0 : i64, scratch_operands = 0 : i64, tpu.core_type = #tpu.core_type<tc>, window_params = [{transform_indices = @transform_0, window_bounds = array<i64: 8, 32>}, {pipeline_mode = #tpu.pipeline_mode<synchronous>, transform_indices = @transform_1, window_bounds = array<i64: 1, 1>}, {pipeline_mode = #tpu.pipeline_mode<synchronous>, transform_indices = @transform_2, window_bounds = array<i64: 32, 32>}, {pipeline_mode = #tpu.pipeline_mode<synchronous>, transform_indices = @transform_3, window_bounds = array<i64: 1, 32>}, {pipeline_mode = #tpu.pipeline_mode<synchronous>, transform_indices = @transform_4, window_bounds = array<i64: 1, 16>}, {pipeline_mode = #tpu.pipeline_mode<synchronous>, transform_indices = @transform_5, window_bounds = array<i64: 1, 16>}, {pipeline_mode = #tpu.pipeline_mode<synchronous>, transform_indices = @transform_6, window_bounds = array<i64: 16, 32>}, {pipeline_mode = #tpu.pipeline_mode<synchronous>, transform_indices = @transform_7, window_bounds = array<i64: 1, 32>}, {pipeline_mode = #tpu.pipeline_mode<synchronous>, transform_indices = @transform_8, window_bounds = array<i64: 1, 32>}, {pipeline_mode = #tpu.pipeline_mode<synchronous>, transform_indices = @transform_9, window_bounds = array<i64: 1, 32>}, {pipeline_mode = #tpu.pipeline_mode<synchronous>, transform_indices = @transform_10, window_bounds = array<i64: 1, 16>}, {pipeline_mode = #tpu.pipeline_mode<synchronous>, transform_indices = @transform_11, window_bounds = array<i64: 1, 1>}, {transform_indices = @transform_12, window_bounds = array<i64: 8, 32>}, {transform_indices = @transform_13, window_bounds = array<i64: 8, 1>}]} {
    %c0 = arith.constant 0 : index
    %c0_0 = arith.constant 0 : index
    %0 = vector.load %arg1[%c0, %c0_0] : memref<8x32xf32, #tpu.memory_space<vmem>>, vector<8x32xf32>
    %c0_1 = arith.constant 0 : index
    %c0_2 = arith.constant 0 : index
    %1 = vector.load %arg3[%c0_1, %c0_2] : memref<32x32xf32, #tpu.memory_space<vmem>>, vector<32x32xf32>
    %cst = arith.constant dense<0.000000e+00> : vector<8x32xf32>
    %2 = tpu.matmul %0, %1, %cst {dimension_numbers = #tpu.dot_dimension_numbers<[1], [0], [0], [1], [0, 0, 1, 1], [], []>} : vector<8x32xf32>, vector<32x32xf32>, vector<8x32xf32> -> vector<8x32xf32>
    %c0_3 = arith.constant 0 : index
    %c0_4 = arith.constant 0 : index
    %3 = vector.load %arg4[%c0_3, %c0_4] : memref<1x32xf32, #tpu.memory_space<vmem>>, vector<1x32xf32>
    %4 = vector.broadcast %3 : vector<1x32xf32> to vector<8x32xf32>
    %5 = arith.addf %2, %4 : vector<8x32xf32>
    %6 = vector.extract_strided_slice %5 {offsets = [0, 0], sizes = [8, 16], strides = [1, 1]} : vector<8x32xf32> to vector<8x16xf32>
    %7 = vector.extract_strided_slice %5 {offsets = [0, 16], sizes = [8, 16], strides = [1, 1]} : vector<8x32xf32> to vector<8x16xf32>
    %cst_5 = arith.constant 5.000000e-01 : f32
    %8 = vector.broadcast %cst_5 : f32 to vector<8x16xf32>
    %9 = arith.mulf %8, %7 : vector<8x16xf32>
    %cst_6 = arith.constant 0.707106769 : f32
    %10 = vector.broadcast %cst_6 : f32 to vector<8x16xf32>
    %11 = arith.mulf %7, %10 : vector<8x16xf32>
    %12 = math.absf %11 : vector<8x16xf32>
    %cst_7 = arith.constant 0.327591091 : f32
    %13 = vector.broadcast %cst_7 : f32 to vector<8x16xf32>
    %14 = arith.mulf %13, %12 : vector<8x16xf32>
    %cst_8 = arith.constant 1.000000e+00 : f32
    %15 = vector.broadcast %cst_8 : f32 to vector<8x16xf32>
    %16 = arith.addf %15, %14 : vector<8x16xf32>
    %cst_9 = arith.constant 1.000000e+00 : f32
    %17 = vector.broadcast %cst_9 : f32 to vector<8x16xf32>
    %18 = arith.divf %17, %16 : vector<8x16xf32>
    %cst_10 = arith.constant 1.06140542 : f32
    %19 = vector.broadcast %cst_10 : f32 to vector<8x16xf32>
    %20 = arith.mulf %19, %18 : vector<8x16xf32>
    %cst_11 = arith.constant -1.45315206 : f32
    %21 = vector.broadcast %cst_11 : f32 to vector<8x16xf32>
    %22 = arith.addf %20, %21 : vector<8x16xf32>
    %23 = arith.mulf %22, %18 : vector<8x16xf32>
    %cst_12 = arith.constant 1.42141378 : f32
    %24 = vector.broadcast %cst_12 : f32 to vector<8x16xf32>
    %25 = arith.addf %23, %24 : vector<8x16xf32>
    %26 = arith.mulf %25, %18 : vector<8x16xf32>
    %cst_13 = arith.constant -0.284496725 : f32
    %27 = vector.broadcast %cst_13 : f32 to vector<8x16xf32>
    %28 = arith.addf %26, %27 : vector<8x16xf32>
    %29 = arith.mulf %28, %18 : vector<8x16xf32>
    %cst_14 = arith.constant 0.254829586 : f32
    %30 = vector.broadcast %cst_14 : f32 to vector<8x16xf32>
    %31 = arith.addf %29, %30 : vector<8x16xf32>
    %32 = arith.mulf %31, %18 : vector<8x16xf32>
    %cst_15 = arith.constant 0.000000e+00 : f32
    %33 = vector.broadcast %cst_15 : f32 to vector<8x16xf32>
    %34 = arith.subf %33, %12 : vector<8x16xf32>
    %35 = arith.mulf %34, %12 : vector<8x16xf32>
    %36 = math.exp %35 : vector<8x16xf32>
    %37 = arith.mulf %32, %36 : vector<8x16xf32>
    %cst_16 = arith.constant 1.000000e+00 : f32
    %38 = vector.broadcast %cst_16 : f32 to vector<8x16xf32>
    %39 = arith.subf %38, %37 : vector<8x16xf32>
    %cst_17 = arith.constant 0.000000e+00 : f32
    %40 = vector.broadcast %cst_17 : f32 to vector<8x16xf32>
    %41 = arith.cmpf oge, %11, %40 : vector<8x16xf32>
    %cst_18 = arith.constant 0.000000e+00 : f32
    %42 = vector.broadcast %cst_18 : f32 to vector<8x16xf32>
    %43 = arith.subf %42, %39 : vector<8x16xf32>
    %44 = arith.select %41, %39, %43 : vector<8x16xi1>, vector<8x16xf32>
    %cst_19 = arith.constant 1.000000e+00 : f32
    %45 = vector.broadcast %cst_19 : f32 to vector<8x16xf32>
    %46 = arith.addf %45, %44 : vector<8x16xf32>
    %47 = arith.mulf %9, %46 : vector<8x16xf32>
    %c0_20 = arith.constant 0 : index
    %c0_21 = arith.constant 0 : index
    %48 = vector.load %arg11[%c0_20, %c0_21] : memref<1x16xf32, #tpu.memory_space<vmem>>, vector<1x16xf32>
    %49 = vector.broadcast %48 : vector<1x16xf32> to vector<8x16xf32>
    %50 = arith.mulf %47, %49 : vector<8x16xf32>
    %cst_22 = arith.constant dense<0.000000e+00> : vector<8xf32>
    %51 = vector.multi_reduction <add>, %50, %cst_22 [1] : vector<8x16xf32> to vector<8xf32>
    %52 = vector.shape_cast %51 : vector<8xf32> to vector<8x1xf32>
    %c0_23 = arith.constant 0 : index
    %c0_24 = arith.constant 0 : index
    %53 = vector.load %arg12[%c0_23, %c0_24] : memref<1x1xf32, #tpu.memory_space<vmem>>, vector<1x1xf32>
    %54 = vector.broadcast %53 : vector<1x1xf32> to vector<8x1xf32>
    %55 = arith.addf %52, %54 : vector<8x1xf32>
    %c0_25 = arith.constant 0 : index
    %c0_26 = arith.constant 0 : index
    %56 = vector.load %arg2[%c0_25, %c0_26] : memref<1x1xf32, #tpu.memory_space<vmem>>, vector<1x1xf32>
    %57 = vector.broadcast %56 : vector<1x1xf32> to vector<8x1xf32>
    %58 = arith.cmpf ogt, %55, %57 : vector<8x1xf32>
    %c0_27 = arith.constant 0 : index
    %c0_28 = arith.constant 0 : index
    %59 = vector.load %arg5[%c0_27, %c0_28] : memref<1x16xf32, #tpu.memory_space<vmem>>, vector<1x16xf32>
    %c0_29 = arith.constant 0 : index
    %c0_30 = arith.constant 0 : index
    %60 = vector.load %arg6[%c0_29, %c0_30] : memref<1x16xf32, #tpu.memory_space<vmem>>, vector<1x16xf32>
    %cst_31 = arith.constant dense<0.000000e+00> : vector<8xf32>
    %61 = vector.multi_reduction <add>, %6, %cst_31 [1] : vector<8x16xf32> to vector<8xf32>
    %62 = vector.shape_cast %61 : vector<8xf32> to vector<8x1xf32>
    %63 = arith.mulf %6, %6 : vector<8x16xf32>
    %cst_32 = arith.constant dense<0.000000e+00> : vector<8xf32>
    %64 = vector.multi_reduction <add>, %63, %cst_32 [1] : vector<8x16xf32> to vector<8xf32>
    %65 = vector.shape_cast %64 : vector<8xf32> to vector<8x1xf32>
    %cst_33 = arith.constant 6.250000e-02 : f32
    %66 = vector.broadcast %cst_33 : f32 to vector<8x1xf32>
    %67 = arith.mulf %62, %66 : vector<8x1xf32>
    %cst_34 = arith.constant 6.250000e-02 : f32
    %68 = vector.broadcast %cst_34 : f32 to vector<8x1xf32>
    %69 = arith.mulf %65, %68 : vector<8x1xf32>
    %70 = arith.mulf %67, %67 : vector<8x1xf32>
    %71 = arith.subf %69, %70 : vector<8x1xf32>
    %cst_35 = arith.constant 0.000000e+00 : f32
    %72 = vector.broadcast %cst_35 : f32 to vector<8x1xf32>
    %73 = arith.maximumf %71, %72 : vector<8x1xf32>
    %cst_36 = arith.constant 9.99999974E-6 : f32
    %74 = vector.broadcast %cst_36 : f32 to vector<8x1xf32>
    %75 = arith.addf %73, %74 : vector<8x1xf32>
    %76 = math.rsqrt %75 : vector<8x1xf32>
    %77 = vector.broadcast %67 : vector<8x1xf32> to vector<8x16xf32>
    %78 = arith.subf %6, %77 : vector<8x16xf32>
    %79 = vector.broadcast %76 : vector<8x1xf32> to vector<8x16xf32>
    %80 = arith.mulf %78, %79 : vector<8x16xf32>
    %81 = vector.broadcast %59 : vector<1x16xf32> to vector<8x16xf32>
    %82 = arith.mulf %80, %81 : vector<8x16xf32>
    %83 = vector.broadcast %60 : vector<1x16xf32> to vector<8x16xf32>
    %84 = arith.addf %82, %83 : vector<8x16xf32>
    %cst_37 = arith.constant 5.000000e-01 : f32
    %85 = vector.broadcast %cst_37 : f32 to vector<8x16xf32>
    %86 = arith.mulf %85, %84 : vector<8x16xf32>
    %cst_38 = arith.constant 0.707106769 : f32
    %87 = vector.broadcast %cst_38 : f32 to vector<8x16xf32>
    %88 = arith.mulf %84, %87 : vector<8x16xf32>
    %89 = math.absf %88 : vector<8x16xf32>
    %cst_39 = arith.constant 0.327591091 : f32
    %90 = vector.broadcast %cst_39 : f32 to vector<8x16xf32>
    %91 = arith.mulf %90, %89 : vector<8x16xf32>
    %cst_40 = arith.constant 1.000000e+00 : f32
    %92 = vector.broadcast %cst_40 : f32 to vector<8x16xf32>
    %93 = arith.addf %92, %91 : vector<8x16xf32>
    %cst_41 = arith.constant 1.000000e+00 : f32
    %94 = vector.broadcast %cst_41 : f32 to vector<8x16xf32>
    %95 = arith.divf %94, %93 : vector<8x16xf32>
    %cst_42 = arith.constant 1.06140542 : f32
    %96 = vector.broadcast %cst_42 : f32 to vector<8x16xf32>
    %97 = arith.mulf %96, %95 : vector<8x16xf32>
    %cst_43 = arith.constant -1.45315206 : f32
    %98 = vector.broadcast %cst_43 : f32 to vector<8x16xf32>
    %99 = arith.addf %97, %98 : vector<8x16xf32>
    %100 = arith.mulf %99, %95 : vector<8x16xf32>
    %cst_44 = arith.constant 1.42141378 : f32
    %101 = vector.broadcast %cst_44 : f32 to vector<8x16xf32>
    %102 = arith.addf %100, %101 : vector<8x16xf32>
    %103 = arith.mulf %102, %95 : vector<8x16xf32>
    %cst_45 = arith.constant -0.284496725 : f32
    %104 = vector.broadcast %cst_45 : f32 to vector<8x16xf32>
    %105 = arith.addf %103, %104 : vector<8x16xf32>
    %106 = arith.mulf %105, %95 : vector<8x16xf32>
    %cst_46 = arith.constant 0.254829586 : f32
    %107 = vector.broadcast %cst_46 : f32 to vector<8x16xf32>
    %108 = arith.addf %106, %107 : vector<8x16xf32>
    %109 = arith.mulf %108, %95 : vector<8x16xf32>
    %cst_47 = arith.constant 0.000000e+00 : f32
    %110 = vector.broadcast %cst_47 : f32 to vector<8x16xf32>
    %111 = arith.subf %110, %89 : vector<8x16xf32>
    %112 = arith.mulf %111, %89 : vector<8x16xf32>
    %113 = math.exp %112 : vector<8x16xf32>
    %114 = arith.mulf %109, %113 : vector<8x16xf32>
    %cst_48 = arith.constant 1.000000e+00 : f32
    %115 = vector.broadcast %cst_48 : f32 to vector<8x16xf32>
    %116 = arith.subf %115, %114 : vector<8x16xf32>
    %cst_49 = arith.constant 0.000000e+00 : f32
    %117 = vector.broadcast %cst_49 : f32 to vector<8x16xf32>
    %118 = arith.cmpf oge, %88, %117 : vector<8x16xf32>
    %cst_50 = arith.constant 0.000000e+00 : f32
    %119 = vector.broadcast %cst_50 : f32 to vector<8x16xf32>
    %120 = arith.subf %119, %116 : vector<8x16xf32>
    %121 = arith.select %118, %116, %120 : vector<8x16xi1>, vector<8x16xf32>
    %cst_51 = arith.constant 1.000000e+00 : f32
    %122 = vector.broadcast %cst_51 : f32 to vector<8x16xf32>
    %123 = arith.addf %122, %121 : vector<8x16xf32>
    %124 = arith.mulf %86, %123 : vector<8x16xf32>
    %c0_52 = arith.constant 0 : index
    %c0_53 = arith.constant 0 : index
    %125 = vector.load %arg7[%c0_52, %c0_53] : memref<16x32xf32, #tpu.memory_space<vmem>>, vector<16x32xf32>
    %cst_54 = arith.constant dense<0.000000e+00> : vector<8x32xf32>
    %126 = tpu.matmul %124, %125, %cst_54 {dimension_numbers = #tpu.dot_dimension_numbers<[1], [0], [0], [1], [0, 0, 1, 1], [], []>} : vector<8x16xf32>, vector<16x32xf32>, vector<8x32xf32> -> vector<8x32xf32>
    %c0_55 = arith.constant 0 : index
    %c0_56 = arith.constant 0 : index
    %127 = vector.load %arg8[%c0_55, %c0_56] : memref<1x32xf32, #tpu.memory_space<vmem>>, vector<1x32xf32>
    %128 = vector.broadcast %127 : vector<1x32xf32> to vector<8x32xf32>
    %129 = arith.addf %126, %128 : vector<8x32xf32>
    %c0_57 = arith.constant 0 : index
    %c0_58 = arith.constant 0 : index
    %130 = vector.load %arg9[%c0_57, %c0_58] : memref<1x32xf32, #tpu.memory_space<vmem>>, vector<1x32xf32>
    %c0_59 = arith.constant 0 : index
    %c0_60 = arith.constant 0 : index
    %131 = vector.load %arg10[%c0_59, %c0_60] : memref<1x32xf32, #tpu.memory_space<vmem>>, vector<1x32xf32>
    %cst_61 = arith.constant dense<0.000000e+00> : vector<8xf32>
    %132 = vector.multi_reduction <add>, %129, %cst_61 [1] : vector<8x32xf32> to vector<8xf32>
    %133 = vector.shape_cast %132 : vector<8xf32> to vector<8x1xf32>
    %134 = arith.mulf %129, %129 : vector<8x32xf32>
    %cst_62 = arith.constant dense<0.000000e+00> : vector<8xf32>
    %135 = vector.multi_reduction <add>, %134, %cst_62 [1] : vector<8x32xf32> to vector<8xf32>
    %136 = vector.shape_cast %135 : vector<8xf32> to vector<8x1xf32>
    %cst_63 = arith.constant 3.125000e-02 : f32
    %137 = vector.broadcast %cst_63 : f32 to vector<8x1xf32>
    %138 = arith.mulf %133, %137 : vector<8x1xf32>
    %cst_64 = arith.constant 3.125000e-02 : f32
    %139 = vector.broadcast %cst_64 : f32 to vector<8x1xf32>
    %140 = arith.mulf %136, %139 : vector<8x1xf32>
    %141 = arith.mulf %138, %138 : vector<8x1xf32>
    %142 = arith.subf %140, %141 : vector<8x1xf32>
    %cst_65 = arith.constant 0.000000e+00 : f32
    %143 = vector.broadcast %cst_65 : f32 to vector<8x1xf32>
    %144 = arith.maximumf %142, %143 : vector<8x1xf32>
    %cst_66 = arith.constant 9.99999974E-6 : f32
    %145 = vector.broadcast %cst_66 : f32 to vector<8x1xf32>
    %146 = arith.addf %144, %145 : vector<8x1xf32>
    %147 = math.rsqrt %146 : vector<8x1xf32>
    %148 = vector.broadcast %138 : vector<8x1xf32> to vector<8x32xf32>
    %149 = arith.subf %129, %148 : vector<8x32xf32>
    %150 = vector.broadcast %147 : vector<8x1xf32> to vector<8x32xf32>
    %151 = arith.mulf %149, %150 : vector<8x32xf32>
    %152 = vector.broadcast %130 : vector<1x32xf32> to vector<8x32xf32>
    %153 = arith.mulf %151, %152 : vector<8x32xf32>
    %154 = vector.broadcast %131 : vector<1x32xf32> to vector<8x32xf32>
    %155 = arith.addf %153, %154 : vector<8x32xf32>
    %156 = vector.shape_cast %58 : vector<8x1xi1> to vector<8x1xi1>
    %157 = vector.broadcast %156 : vector<8x1xi1> to vector<8x32xi1>
    %158 = arith.select %157, %0, %155 : vector<8x32xi1>, vector<8x32xf32>
    %c0_67 = arith.constant 0 : index
    %c0_68 = arith.constant 0 : index
    %159 = vector.load %arg13[%c0_67, %c0_68] : memref<8x32xf32, #tpu.memory_space<vmem>>, vector<8x32xf32>
    tpu.vector_store %arg13[%c0_67, %c0_68], %158 {strides = array<i32>} : memref<8x32xf32, #tpu.memory_space<vmem>>, vector<8x32xf32>,
    %160 = arith.extui %58 : vector<8x1xi1> to vector<8x1xi32>
    %161 = arith.sitofp %160 : vector<8x1xi32> to vector<8x1xf32>
    %c0_69 = arith.constant 0 : index
    %c0_70 = arith.constant 0 : index
    %162 = vector.load %arg14[%c0_69, %c0_70] : memref<8x1xf32, #tpu.memory_space<vmem>>, vector<8x1xf32>
    tpu.vector_store %arg14[%c0_69, %c0_70], %161 {strides = array<i32>} : memref<8x1xf32, #tpu.memory_space<vmem>>, vector<8x1xf32>,
    return
  }
  func.func @transform_0(%arg0: i32) -> (i32, i32) {
    %c0_i32 = arith.constant 0 : i32
    %c0_i32_0 = arith.constant 0 : i32
    return %arg0, %c0_i32 : i32, i32
  }
  func.func @transform_1(%arg0: i32) -> (i32, i32) {
    %c0_i32 = arith.constant 0 : i32
    %c0_i32_0 = arith.constant 0 : i32
    %c0_i32_1 = arith.constant 0 : i32
    return %c0_i32, %c0_i32_0 : i32, i32
  }
  func.func @transform_2(%arg0: i32) -> (i32, i32) {
    %c0_i32 = arith.constant 0 : i32
    %c0_i32_0 = arith.constant 0 : i32
    %c0_i32_1 = arith.constant 0 : i32
    return %c0_i32, %c0_i32_0 : i32, i32
  }
  func.func @transform_3(%arg0: i32) -> (i32, i32) {
    %c0_i32 = arith.constant 0 : i32
    %c0_i32_0 = arith.constant 0 : i32
    %c0_i32_1 = arith.constant 0 : i32
    return %c0_i32, %c0_i32_0 : i32, i32
  }
  func.func @transform_4(%arg0: i32) -> (i32, i32) {
    %c0_i32 = arith.constant 0 : i32
    %c0_i32_0 = arith.constant 0 : i32
    %c0_i32_1 = arith.constant 0 : i32
    return %c0_i32, %c0_i32_0 : i32, i32
  }
  func.func @transform_5(%arg0: i32) -> (i32, i32) {
    %c0_i32 = arith.constant 0 : i32
    %c0_i32_0 = arith.constant 0 : i32
    %c0_i32_1 = arith.constant 0 : i32
    return %c0_i32, %c0_i32_0 : i32, i32
  }
  func.func @transform_6(%arg0: i32) -> (i32, i32) {
    %c0_i32 = arith.constant 0 : i32
    %c0_i32_0 = arith.constant 0 : i32
    %c0_i32_1 = arith.constant 0 : i32
    return %c0_i32, %c0_i32_0 : i32, i32
  }
  func.func @transform_7(%arg0: i32) -> (i32, i32) {
    %c0_i32 = arith.constant 0 : i32
    %c0_i32_0 = arith.constant 0 : i32
    %c0_i32_1 = arith.constant 0 : i32
    return %c0_i32, %c0_i32_0 : i32, i32
  }
  func.func @transform_8(%arg0: i32) -> (i32, i32) {
    %c0_i32 = arith.constant 0 : i32
    %c0_i32_0 = arith.constant 0 : i32
    %c0_i32_1 = arith.constant 0 : i32
    return %c0_i32, %c0_i32_0 : i32, i32
  }
  func.func @transform_9(%arg0: i32) -> (i32, i32) {
    %c0_i32 = arith.constant 0 : i32
    %c0_i32_0 = arith.constant 0 : i32
    %c0_i32_1 = arith.constant 0 : i32
    return %c0_i32, %c0_i32_0 : i32, i32
  }
  func.func @transform_10(%arg0: i32) -> (i32, i32) {
    %c0_i32 = arith.constant 0 : i32
    %c0_i32_0 = arith.constant 0 : i32
    %c0_i32_1 = arith.constant 0 : i32
    return %c0_i32, %c0_i32_0 : i32, i32
  }
  func.func @transform_11(%arg0: i32) -> (i32, i32) {
    %c0_i32 = arith.constant 0 : i32
    %c0_i32_0 = arith.constant 0 : i32
    %c0_i32_1 = arith.constant 0 : i32
    return %c0_i32, %c0_i32_0 : i32, i32
  }
  func.func @transform_12(%arg0: i32) -> (i32, i32) {
    %c0_i32 = arith.constant 0 : i32
    %c0_i32_0 = arith.constant 0 : i32
    return %arg0, %c0_i32 : i32, i32
  }
  func.func @transform_13(%arg0: i32) -> (i32, i32) {
    %c0_i32 = arith.constant 0 : i32
    %c0_i32_0 = arith.constant 0 : i32
    return %arg0, %c0_i32 : i32, i32
  }
}

</mosaic_0001>

<bundles_post_ra>
// kernel: tpu_custom_call.1
= control target key start
LH: loop header
LB: loop body
LE: loop exit
PB: predicated region body
PF: predicated region fallthrough
CT: control target
= control target key end

     0   :  { %s1446_s0 = inlined_call_operand.hbm [shape: f32[16,32], index: 0, kind: input, shape index: {}]   ;;  %s1447_s1 = inlined_call_operand.<no memory space> [shape: f32[1,1], index: 1, kind: input, shape index: {}]   ;;  %s1448_s2 = inlined_call_operand.hbm [shape: f32[32,32], index: 2, kind: input, shape index: {}]   ;;  %s1449_s3 = inlined_call_operand.vmem [shape: f32[1,32], index: 3, kind: input, shape index: {}]   ;;  %s1450_s4 = inlined_call_operand.vmem [shape: f32[1,16], index: 4, kind: input, shape index: {}]   ;;  %s1451_s5 = inlined_call_operand.vmem [shape: f32[1,16], index: 5, kind: input, shape index: {}]   ;;  %s1452_s6 = inlined_call_operand.hbm [shape: f32[16,32], index: 6, kind: input, shape index: {}]   ;;  %s1453_s7 = inlined_call_operand.vmem [shape: f32[1,32], index: 7, kind: input, shape index: {}]   ;;  %s1454_s8 = inlined_call_operand.vmem [shape: f32[1,32], index: 8, kind: input, shape index: {}]   ;;  %s1455_s9 = inlined_call_operand.vmem [shape: f32[1,32], index: 9, kind: input, shape index: {}]   ;;  %s1456_s10 = inlined_call_operand.vmem [shape: f32[1,16], index: 10, kind: input, shape index: {}]   ;;  %s1457_s12 = inlined_call_operand.hbm [shape: f32[16,32], index: 12, kind: output, shape index: {0}]   ;;  %s1458_s13 = inlined_call_operand.vmem [shape: f32[16,1], index: 13, kind: output, shape index: {1}]   ;;  %s1459_s11 = inlined_call_operand.<no memory space> [shape: f32[1,1], index: 11, kind: input, shape index: {}]  }
   0x1   :  { %1464 = sst [smem:[#allocation18_spill]] %s1448_s2  ;;  %v19_v0 = vstv %s1447_s1  ;;  %v21_v1 = vstv %s1459_s11 }
   0x2   :  { %1465 = sst [smem:[#allocation19_spill]] %s1452_s6  ;;  %20 = vst [vmem:[#allocation2] sm:$0x1] %v19_v0 }
   0x3   :  { %22 = vst [vmem:[#allocation3] sm:$0x1] %v21_v1 }
   0x4   :  { %23 = vsyncpa [#allocation5], 0 }
   0x5   :  { %25 = vsyncpa [#allocation5 + $0x1], 0 }
   0x6   :  { %26 = vsyncpa [#allocation8], 0 }
   0x7   :  { %27 = vsyncpa [#allocation6], 0 }
   0x8   :  { %29 = vsyncpa [#allocation6 + $0x1], 0  ;;  %s1251_s29 = smov 0   ;;  %s1253_s30 = smov 0  }
   0x9   :  { %s1255_s14 = smov 0   ;;  %s1257_s15 = smov 0  }
   0xa LB: > { %1466 = sst [smem:[#allocation14_spill]] %s1161_s14  ;;  %s1275_s17 = sadd.s32 4294967295, %s1165_s15   ;;  %s1165_s15 = sphi %s1257_s15, %s1480_s15   ;;  %s1161_s14 = sphi %s1255_s14, %s1482_s14   ;;  %s1157_s30 = sphi %s1253_s30, %s1484_s30   ;;  %s1153_s29 = sphi %s1251_s29, %s1483_s29  }
   0xb   : > { %s1467_s2 = sld [smem:[#allocation18_spill]]  ;;  %p890_p0 = scmp.ge.s32.totalorder %s1165_s15, 1 }
   0xc   : > { %p56_p1 = scmp.eq.s32.totalorder %s1275_s17, 0  ;;  %p349_p2 = scmp.lt.s32.totalorder %s1165_s15, 3 }
   0xd   : > { %s1167_s19 = smov [#allocation7]   ;;  %s1469_s6 = sld [smem:[#allocation19_spill]] }
   0xe   : > { %p1280_p3 = pnand %p890_p0, %p349_p2  ;;  %s365_s20 = sshll.u32 %s1167_s19, 4  ;;  %s366_s20 = int_to_ptr.vmem [resolvable:$true] %s365_s20 }
   0xf   : > { %s1168_s24 = smov [#allocation9]   ;;  %s1169_s26 = smov 128  }
  0x10   : > { %p921_p4 = pneg %p1280_p3  ;;  %s388_s25 = sshll.u32 %s1168_s24, 4  ;;  %s389_s25 = int_to_ptr.vmem [resolvable:$true] %s388_s25 }
  0x11   : > { %s363_s16 = sshll.u32 %s1467_s2, 4  ;;  %s1170_s27 = smov 8   ;;  %s364_s16 = int_to_ptr.hbm [resolvable:$true] %s363_s16 }
  0x12   : > { %p922_p6 = pnand %p921_p4, %p56_p1  ;;  %s889_s28 = sadd.s32 4294967294, %s1165_s15  }
  0x13   : > { %s386_s23 = sshll.u32 %s1469_s6, 4  ;;  %s1294_s1 = sadd.s32 1, %s1165_s15   ;;  %s387_s23 = int_to_ptr.hbm [resolvable:$true] %s386_s23 }
  0x14   : > { %924 = dma.hbm_to_vmem [thread:$0]  (!%p922_p6), %s364_s16, 512, %s366_s20, [#allocation8], %s1169_s26, %s1169_s26, %s1170_s27  }
  0x15   : > { %927 = dma.hbm_to_vmem [thread:$0]  (!%p922_p6), %s387_s23, 256, %s389_s25, [#allocation8], %s1169_s26, %s1169_s26, %s1170_s27  }
  0x16   : > { %1470 = sst [smem:[#allocation15_spill]] %s1294_s1  ;;  %s39_s11 = ssub.s32 %s1165_s15, %s1294_s1 }
  0x17   : > { %s42_s19 = sadd.s32 1, %s1161_s14  ;;  %p40_p7 = scmp.eq.s32.totalorder %s39_s11, 0 }
  0x18   : > { %p49_p8 = scmp.ne.s32.totalorder %s1161_s14, %s1157_s30  ;;  %p50_p9 = scmp.eq.s32.totalorder %s1165_s15, 0 }
  0x19   : > { %p55_p10 = scmp.ne.s32.totalorder %s1157_s30, %s1153_s29  ;;  %p310_p13 = scmp.eq.s32.totalorder %s1275_s17, 1 }
  0x1a   : > { %s1305_s21 = scalar_select %p40_p7, %s1161_s14, %s42_s19  }
  0x1b   : > { %p1307_p11 = por %p50_p9, %p49_p8  ;;  %p1313_p12 = por %p56_p1, %p55_p10 }
  0x1c   : > { %1471 = sst [smem:[#allocation16_spill]] %s1305_s21  ;;  %p316_p0 = scmp.eq.s32.totalorder %s889_s28, 1 }
  0x1d   : > { %p938_p2 = scmp.lt.s32.totalorder %s1165_s15, 2  ;;  %s417_s20 = sand.u32 1, %s1161_s14  }
  0x1e   : > { %p1320_p4 = por %p310_p13, %p49_p8  ;;  %p1324_p6 = por %p316_p0, %p55_p10 }
  0x1f   : > { %s894_s25 = sshll.u32 %s417_s20, 3  ;;  %s895_s26 = sshll.u32 %s1165_s15, 3 }
  0x20   : > { %s1475_s24 = scalar_select %p1324_p6, 1, 0 }
  0x21   : > { %s425_s19 = scalar_lea.hbm %s1446_s0, %s895_s26  ;;  %s421_s2 = scalar_lea.vmem [#allocation4], %s894_s25 }
  0x22   : > { %1476 = sst [smem:[#allocation17_spill]] %s1475_s24  ;;  %s429_s6 = sshll.u32 %s421_s2, 4  ;;  %s430_s6 = int_to_ptr.vmem [resolvable:$true] %s429_s6 }
  0x23   : > { %s427_s21 = sshll.u32 %s425_s19, 4  ;;  %p1334_p7 = pnand %p938_p2, %p1307_p11  ;;  %s428_s21 = int_to_ptr.hbm [resolvable:$true] %s427_s21 }
  0x24   : > { %s418_s14 = scalar_lea.sflag [#allocation5], %s417_s20  ;;  %s1065_s1 = sshra.s32 %s428_s21, 4  ;;  %s1066_s1 = int_to_ptr.hbm [resolvable:$true] %s1065_s1 }
  0x25   : > { %s1067_s24 = scalar_lea.hbm %s1066_s1, 8  ;;  %p1069_p9 = pneg %p1334_p7 }
  0x26   : > { %p1068_p8 = scmp.ne.s32.totalorder %s1066_s1, %s1067_s24  ;;  %s1072_s26 = scalar_lea.hbm %s1446_s0, 16 }
  0x27   : > { %p1073_p11 = scmp.lt.s32.totalorder %s1066_s1, %s1446_s0  ;;  %p1074_p0 = scmp.lt.s32.totalorder %s1072_s26, %s1067_s24 }
  0x28   : > { %p1070_p10 = pnand %p1069_p9, %p1068_p8 }
  0x29   : > { %p1075_p2 = por %p1074_p0, %p1073_p11 }
  0x2a   : > { %p1071_p13 = pneg %p1070_p10 }
  0x2c   : > { %p1076_p5 = pnand %p1075_p2, %p1071_p13 }
  0x2e   : > { %1079 = shalt.err (!%p1076_p5)
}
  0x2f   : > { %931 = dma.hbm_to_vmem [thread:$0]  (!%p1334_p7), %s428_s21, 128, %s430_s6, %s418_s14  }
  0x30   : > { %438 = sbr.rel (%p1280_p3) target bundleno = 686 (0x2ae), region = 68  ;;  %s1351_s20 = sand.u32 (!%p1280_p3), 1, %s1157_s30  }
  0x31   : > { %s897_s11 = sshll.u32 (!%p1280_p3), %s1351_s20, 3  ;;  %s441_s19 = scalar_lea.sflag (!%p1280_p3), [#allocation5], %s1351_s20 }
  0x32   : > { %s444_s1 = scalar_lea.vmem (!%p1280_p3), [#allocation4], %s897_s11 }
  0x35   : > { %1140 = dma.done.wait (%p1313_p12), %s441_s19, 128  }
  0x36   : > { %1142 = vsyncadd (%p1313_p12), %s441_s19, 4294967168 }
  0x37   : > { %1144 = dma.done.wait (%p56_p1), [#allocation8], 768  }
  0x38   : > { %1146 = vsyncadd (%p56_p1), [#allocation8], 4294966528  ;;  %v510_v2 = vld [vmem:[#allocation7 + $0x18] sm:$0xff]  ;;  %v509_v3 = vld [vmem:[#allocation7 + $0x10] sm:$0xff]  ;;  %s1171_s18 = smov 16   ;;  %vm515_vm0 = vcmask 261120  }
  0x39   : > { %531 = vmatpush.msra.mxu0 %v510_v2  ;;  %v508_v4 = vld [vmem:[#allocation7 + $0x8] sm:$0xff]  ;;  %v507_v5 = vld [vmem:[#allocation7] sm:$0xff]  ;;  %v1368_v7 = vld [vmem:[%s444_s1] sm:$0xff]  ;;  %vm590_vm1 = vcmask 130048   ;;  %s1172_s24 = smov 112   ;;  %p502_p1 = scmp.lt.s32.totalorder %s1275_s17, 1 }
  0x3a   : > { %v984_v6 = vld [vmem:[%s1456_s10] ss:$0 sm:$0xff]  ;;  %v679_v61 = vld [vmem:[#allocation9] sm:$0xff]  ;;  %vm751_vm15 = vcmask 7168   ;;  %s906_s21 = sshll.u32 %s1275_s17, 3  ;;  %s754_s1 = scalar_lea.sflag [#allocation6], %s1351_s20 }
  0x3b   : > { %532 = vmatpush.msra.mxu0 %v509_v3  ;;  %582 = vrot.lane.b32.xlu1 %v984_v6, %s1171_s18  ;;  %v985_v8 = vld [vmem:[%s1449_s3] ss:$0 sm:$0xff]  ;;  %s503_s27 = scalar_select %p502_p1, %s1275_s17, 1 }
  0x3c   : > { %v680_v60 = vld [vmem:[#allocation9 + $0x8] sm:$0xff]  ;;  %s768_s2 = scalar_lea.hbm %s1457_s12, %s906_s21  ;;  %s495_s17 = scalar_lea.vmem [#allocation10], %s897_s11 }
  0x3d   : > { %533 = vmatpush.msra.mxu0 %v508_v4  ;;  %702 = vmatpush.msra.mxu1 %v680_v60  ;;  %v986_v3 = vld [vmem:[%s1450_s4] ss:$0 sm:$0xff]  ;;  %s901_s22 = sshll.u32 %s503_s27, 3  ;;  %s772_s19 = sshll.u32 %s768_s2, 4  ;;  %s773_s19 = int_to_ptr.hbm [resolvable:$true] %s772_s19 }
  0x3e   : > { %v987_v6 = vld [vmem:[%s1451_s5] ss:$0 sm:$0xff]  ;;  %s505_s6 = scalar_lea.vmem %s1458_s13, %s901_s22  ;;  %s770_s22 = sshll.u32 %s495_s17, 4  ;;  %s771_s22 = int_to_ptr.vmem [resolvable:$true] %s770_s22 }
  0x3f   : > { %534 = vmatpush.msra.mxu0 %v507_v5  ;;  %703 = vmatpush.msra.mxu1 %v679_v61  ;;  %s1115_s21 = scalar_lea.hbm %s1457_s12, 16 }
  0x40   : > { %902 = vmatmul.msk.f32.vlgmr.msra.gmra.mxu0 %vm515_vm0, %v1368_v7 }
  0xad   : > { %v583_v47 = vpop.permute.xlu1 %582 }
  0xbd   : > { %v536_v9 = vpop.f32.mrf.mxu0 }
  0xbe   : > { %v1375_v10 = vadd.f32 %v985_v8, %v536_v9 }
  0xc0   : > { %v606_v11 = vsel %vm590_vm1, %v1375_v10, 0.0  ;;  %v540_v12 = vmul.f32 0.70710677, %v1375_v10  ;;  %v609_v14 = vmul.f32 %v1375_v10, %v1375_v10  ;;  %v539_v45 = vmul.f32 0.5, %v1375_v10 }
  0xc1   : > { %607 = vadd.xlane.f32.xlu0 %v606_v11 }
  0xc2   : > { %v541_v13 = vand.u32 2147483647, %v540_v12  ;;  %v610_v17 = vsel %vm590_vm1, %v609_v14, 0.0  ;;  %vm574_vm6 = vcmp.ge.f32.partialorder %v540_v12, 0.0 }
  0xc4   : > { %v542_v15 = vmul.f32 0.3275911, %v541_v13  ;;  %v568_v28 = vsub.f32 0.0, %v541_v13 }
  0xc6   : > { %v543_v16 = vadd.f32 1.0, %v542_v15  ;;  %v569_v31 = vmul.f32 %v568_v28, %v541_v13 }
  0xc8   : > { %993 = vrcp.f32 %v543_v16  ;;  %v555_v21 = vand.u32 2147483648, %v543_v16  ;;  %v553_v23 = vand.u32 2147483647, %v543_v16  ;;  %vm549_vm3 = vweird.f32 %v543_v16 }
  0xc9   : > { %611 = vadd.xlane.f32.xlu0 %v610_v17  ;;  %v570_v34 = vmul.f32 1.442695, %v569_v31 }
  0xca   : > { %v556_v25 = vor.u32 1.1754944e-38, %v555_v21  ;;  %vm554_vm5 = vcmp.eq.f32.partialorder %v553_v23, 8.507059e+37 }
  0xcb   : > { %995 = vpow2.f32 %v570_v34 }
  0xce   : > { %v994_v18 = vpop.eup %993 }
  0xcf   : > { %v545_v19 = vmul.f32 %v994_v18, %v543_v16  ;;  %vm550_vm2 = vweird.f32 %v994_v18 }
  0xd0   : > { %vm551_vm4 = vmor %vm549_vm3, %vm550_vm2 }
  0xd1   : > { %v546_v20 = vsub.f32 1.0, %v545_v19  ;;  %v996_v40 = vpop.eup %995 }
  0xd3   : > { %v547_v22 = vmul.f32 %v994_v18, %v546_v20 }
  0xd5   : > { %v548_v24 = vadd.f32 %v994_v18, %v547_v22 }
  0xd7   : > { %v552_v26 = vsel %vm551_vm4, %v994_v18, %v548_v24 }
  0xd8   : > { %v557_v27 = vsel %vm554_vm5, %v556_v25, %v552_v26 }
  0xd9   : > { %v559_v29 = vmul.f32 1.0614054, %v557_v27 }
  0xdb   : > { %v560_v30 = vadd.f32 -1.4531521, %v559_v29 }
  0xdd   : > { %v561_v32 = vmul.f32 %v560_v30, %v557_v27 }
  0xdf   : > { %v562_v33 = vadd.f32 1.4214138, %v561_v32 }
  0xe1   : > { %v563_v35 = vmul.f32 %v562_v33, %v557_v27 }
  0xe3   : > { %v564_v36 = vadd.f32 -0.28449672, %v563_v35 }
  0xe5   : > { %v565_v37 = vmul.f32 %v564_v36, %v557_v27 }
  0xe7   : > { %v566_v38 = vadd.f32 0.2548296, %v565_v37 }
  0xe9   : > { %v567_v39 = vmul.f32 %v566_v38, %v557_v27 }
  0xeb   : > { %v572_v41 = vmul.f32 %v996_v40, %v567_v39 }
  0xed   : > { %v573_v42 = vsub.f32 1.0, %v572_v41 }
  0xef   : > { %v575_v43 = vsub.f32 0.0, %v573_v42 }
  0xf1   : > { %v576_v44 = vsel %vm574_vm6, %v573_v42, %v575_v43 }
  0xf2   : > { %v577_v46 = vadd.f32 1.0, %v576_v44 }
  0xf4   : > { %v578_v48 = vmul.f32 %v577_v46, %v539_v45  ;;  %v1173_v46 = vmov 0  }
  0xf5   : > { %982 = vset.pattern.permute.xlu1 %v1173_v46  ;;  %983 = vset.pattern.permute.xlu0 %v1173_v46 }
  0xf6   : > { %v585_v49 = vmul.f32 %v583_v47, %v578_v48  ;;  %v988_v47 = vld [vmem:[#allocation3] ss:$0 sm:$0xff]  ;;  %v989_v48 = vld [vmem:[#allocation2] ss:$0 sm:$0xff] }
  0xf8   : > { %587 = vrot.lane.b32.xlu1 %v585_v49, %s1172_s24 }
 0x134   : > { %v608_v50 = vpop.xlane.xlu0 %607 }
 0x135   : > { %v613_v51 = vmul.f32 0.0625, %v608_v50 }
 0x137   : > { %v615_v53 = vmul.f32 %v613_v51, %v613_v51  ;;  %v629_v2 = vsub.f32 %v1375_v10, %v613_v51  ;;  %v1174_v51 = vmov 0.0  }
 0x13c   : > { %v612_v52 = vpop.xlane.xlu0 %611 }
 0x13d   : > { %v614_v54 = vmul.f32 0.0625, %v612_v52 }
 0x13f   : > { %v616_v55 = vsub.f32 %v614_v54, %v615_v53  ;;  %v990_v54 = vld [vmem:[%s1453_s7] ss:$0 sm:$0xff] }
 0x141   : > { %v617_v56 = vmax.f32 %v616_v55, 0.0 }
 0x143   : > { %v618_v57 = vadd.f32 1e-05, %v617_v56 }
 0x145   : > { %997 = vrsqrt.f32 %v618_v57  ;;  %vm625_vm8 = vweird.f32 %v618_v57 }
 0x14b   : > { %v998_v58 = vpop.eup %997 }
 0x14c   : > { %v620_v59 = vmul.f32 %v998_v58, %v618_v57  ;;  %vm626_vm7 = vweird.f32 %v998_v58 }
 0x14d   : > { %vm627_vm9 = vmor %vm625_vm8, %vm626_vm7 }
 0x14e   : > { %v621_v62 = vmul.f32 %v998_v58, %v620_v59 }
 0x150   : > { %v622_v63 = vmul.f32 0.5, %v621_v62 }
 0x152   : > { %v623_v0 = vsub.f32 1.5, %v622_v63 }
 0x154   : > { %v624_v1 = vmul.f32 %v998_v58, %v623_v0 }
 0x156   : > { %v628_v4 = vsel %vm627_vm9, %v998_v58, %v624_v1 }
 0x157   : > { %v630_v5 = vmul.f32 %v629_v2, %v628_v4 }
 0x159   : > { %v634_v8 = vmul.f32 %v986_v3, %v630_v5 }
 0x15b   : > { %v638_v9 = vadd.f32 %v987_v6, %v634_v8 }
 0x15d   : > { %v640_v11 = vmul.f32 0.70710677, %v638_v9  ;;  %v639_v43 = vmul.f32 0.5, %v638_v9 }
 0x15f   : > { %v641_v12 = vand.u32 2147483647, %v640_v11  ;;  %vm674_vm14 = vcmp.ge.f32.partialorder %v640_v11, 0.0 }
 0x161   : > { %v642_v13 = vmul.f32 0.3275911, %v641_v12  ;;  %v668_v26 = vsub.f32 0.0, %v641_v12 }
 0x163   : > { %v643_v14 = vadd.f32 1.0, %v642_v13  ;;  %v669_v29 = vmul.f32 %v668_v26, %v641_v12  ;;  %v991_v13 = vld [vmem:[%s1454_s8] ss:$0 sm:$0xff] }
 0x165   : > { %999 = vrcp.f32 %v643_v14  ;;  %v655_v19 = vand.u32 2147483648, %v643_v14  ;;  %v653_v21 = vand.u32 2147483647, %v643_v14  ;;  %vm649_vm11 = vweird.f32 %v643_v14 }
 0x166   : > { %v670_v32 = vmul.f32 1.442695, %v669_v29 }
 0x167   : > { %v656_v23 = vor.u32 1.1754944e-38, %v655_v19  ;;  %vm654_vm13 = vcmp.eq.f32.partialorder %v653_v21, 8.507059e+37 }
 0x168   : > { %1001 = vpow2.f32 %v670_v32 }
 0x16a   : > { %v588_v15 = vpop.permute.xlu1 %587 }
 0x16b   : > { %v1000_v10 = vpop.eup %999  ;;  %v591_v16 = vsel %vm590_vm1, %v588_v15, 0.0 }
 0x16c   : > { %592 = vadd.xlane.f32.xlu2 %v591_v16  ;;  %v645_v17 = vmul.f32 %v1000_v10, %v643_v14  ;;  %vm650_vm10 = vweird.f32 %v1000_v10 }
 0x16d   : > { %vm651_vm12 = vmor %vm649_vm11, %vm650_vm10 }
 0x16e   : > { %v646_v18 = vsub.f32 1.0, %v645_v17  ;;  %v1002_v38 = vpop.eup %1001 }
 0x170   : > { %v647_v20 = vmul.f32 %v1000_v10, %v646_v18 }
 0x172   : > { %v648_v22 = vadd.f32 %v1000_v10, %v647_v20 }
 0x174   : > { %v652_v24 = vsel %vm651_vm12, %v1000_v10, %v648_v22  ;;  %v992_v10 = vld [vmem:[%s1455_s9] ss:$0 sm:$0xff] }
 0x175   : > { %v657_v25 = vsel %vm654_vm13, %v656_v23, %v652_v24 }
 0x176   : > { %v659_v27 = vmul.f32 1.0614054, %v657_v25 }
 0x178   : > { %v660_v28 = vadd.f32 -1.4531521, %v659_v27 }
 0x17a   : > { %v661_v30 = vmul.f32 %v660_v28, %v657_v25 }
 0x17c   : > { %v662_v31 = vadd.f32 1.4214138, %v661_v30 }
 0x17e   : > { %v663_v33 = vmul.f32 %v662_v31, %v657_v25 }
 0x180   : > { %v664_v34 = vadd.f32 -0.28449672, %v663_v33 }
 0x182   : > { %v665_v35 = vmul.f32 %v664_v34, %v657_v25 }
 0x184   : > { %v666_v36 = vadd.f32 0.2548296, %v665_v35 }
 0x186   : > { %v667_v37 = vmul.f32 %v666_v36, %v657_v25 }
 0x188   : > { %v672_v39 = vmul.f32 %v1002_v38, %v667_v37 }
 0x18a   : > { %v673_v40 = vsub.f32 1.0, %v672_v39 }
 0x18c   : > { %v675_v41 = vsub.f32 0.0, %v673_v40 }
 0x18e   : > { %v676_v42 = vsel %vm674_vm14, %v673_v40, %v675_v41 }
 0x18f   : > { %v677_v44 = vadd.f32 1.0, %v676_v42 }
 0x191   : > { %v678_v45 = vmul.f32 %v677_v44, %v639_v43 }
 0x193   : > { %903 = vmatmul.msk.f32.vlgmr.msra.gmra.mxu1 %vm590_vm1, %v678_v45 }
 0x1df   : > { %v593_v49 = vpop.xlane.xlu2 %592 }
 0x1e0   : > { %v598_v50 = vadd.f32 %v988_v47, %v593_v49 }
 0x1e2   : > { %vm603_vm2 = vcmp.gt.f32.partialorder %v598_v50, %v989_v48 }
 0x1e3   : > { %v904_v52 = vsel %vm603_vm2, 1.0, %v1174_v51  ;;  %v743_v53 = vsel %vm603_vm2, 1, %v1173_v46 }
 0x1e4   : > { %752 = vst.msk [vmem:[%s505_s6] sm:$0xff] %vm751_vm15, %v904_v52  ;;  %745 = vperm.xlu1 %982, %v743_v53   ;;  %s1109_s6 = sshra.s32 %s773_s19, 4  ;;  %s1110_s6 = int_to_ptr.hbm [resolvable:$true] %s1109_s6 }
 0x1e5   : > { %s1111_s14 = scalar_lea.hbm %s1110_s6, 8  ;;  %p1116_p7 = scmp.lt.s32.totalorder %s1110_s6, %s1457_s12 }
 0x1e6   : > { %p1112_p3 = scmp.ne.s32.totalorder %s1110_s6, %s1111_s14  ;;  %p1117_p8 = scmp.lt.s32.totalorder %s1115_s21, %s1111_s14 }
 0x1e8   : > { %p1113_p5 = pnand %p1112_p3, %p1320_p4  ;;  %p1118_p9 = por %p1117_p8, %p1116_p7 }
 0x1ea   : > { %p1114_p12 = pneg %p1113_p5 }
 0x1ec   : > { %p1119_p10 = pnand %p1118_p9, %p1114_p12 }
 0x210   : > { %v705_v55 = vpop.f32.mrf.mxu1 }
 0x211   : > { %v706_v56 = vadd.f32 %v990_v54, %v705_v55 }
 0x213   : > { %v710_v57 = vsel %vm515_vm0, %v706_v56, 0.0  ;;  %v713_v58 = vmul.f32 %v706_v56, %v706_v56 }
 0x214   : > { %711 = vadd.xlane.f32.xlu2 %v710_v57 }
 0x215   : > { %v714_v59 = vsel %vm515_vm0, %v713_v58, 0.0 }
 0x216   : > { %715 = vadd.xlane.f32.xlu0 %v714_v59 }
 0x256   : > { %v746_v16 = vpop.permute.xlu1 %745 }
 0x257   : > { %vm747_vm5 = vcmp.eq.s32.totalorder %v746_v16, 1 }
 0x287   : > { %v712_v60 = vpop.xlane.xlu2 %711 }
 0x288   : > { %v717_v61 = vmul.f32 0.03125, %v712_v60 }
 0x289   : > { %v716_v62 = vpop.xlane.xlu0 %715 }
 0x28a   : > { %v719_v63 = vmul.f32 %v717_v61, %v717_v61  ;;  %v718_v0 = vmul.f32 0.03125, %v716_v62  ;;  %v733_v12 = vsub.f32 %v706_v56, %v717_v61 }
 0x28c   : > { %v720_v1 = vsub.f32 %v718_v0, %v719_v63 }
 0x28e   : > { %v721_v2 = vmax.f32 %v720_v1, 0.0 }
 0x290   : > { %v722_v3 = vadd.f32 1e-05, %v721_v2 }
 0x292   : > { %1003 = vrsqrt.f32 %v722_v3  ;;  %vm729_vm3 = vweird.f32 %v722_v3 }
 0x298   : > { %v1004_v4 = vpop.eup %1003 }
 0x299   : > { %v724_v5 = vmul.f32 %v1004_v4, %v722_v3  ;;  %vm730_vm1 = vweird.f32 %v1004_v4 }
 0x29a   : > { %vm731_vm4 = vmor %vm729_vm3, %vm730_vm1 }
 0x29b   : > { %v725_v6 = vmul.f32 %v1004_v4, %v724_v5 }
 0x29d   : > { %v726_v8 = vmul.f32 0.5, %v725_v6 }
 0x29f   : > { %v727_v9 = vsub.f32 1.5, %v726_v8 }
 0x2a1   : > { %v728_v11 = vmul.f32 %v1004_v4, %v727_v9 }
 0x2a3   : > { %v732_v14 = vsel %vm731_vm4, %v1004_v4, %v728_v11 }
 0x2a4   : > { %v734_v15 = vmul.f32 %v733_v12, %v732_v14 }
 0x2a6   : > { %v738_v17 = vmul.f32 %v991_v13, %v734_v15 }
 0x2a8   : > { %v742_v18 = vadd.f32 %v992_v10, %v738_v17 }
 0x2aa   : > { %v748_v19 = vsel %vm747_vm5, %v1368_v7, %v742_v18 }
 0x2ab   : > { %749 = vst.msk [vmem:[%s495_s17] sm:$0xff] %vm515_vm0, %v748_v19 }
 0x2ac   : > { %1122 = shalt.err (!%p1119_p10)
}
 0x2ad   : > { %919 = dma.vmem_to_hbm [thread:$0]  (%p1320_p4), %s771_s22, 128, %s773_s19, %s754_s1  }
 0x2ae PF: > { %s787_s28 = sand.u32 1, %s1153_s29   ;;  %p1479_p13 = scmp.ge.s32.totalorder %s1165_s15, 2 }
 0x2af   : > { %s788_s25 = scalar_lea.sflag [#allocation6], %s787_s28 }
 0x2b0   : > { %p933_p11 = pnand %p1479_p13, %p1324_p6 }
 0x2b2   : > { %p934_p0 = pneg %p933_p11 }
 0x2b4   : > { %1148 = dma.done.wait (%p934_p0), %s788_s25, 128  }
 0x2b5   : > { %1150 = vsyncadd (%p934_p0), %s788_s25, 4294967168  ;;  %s1480_s15 = sld [smem:[#allocation15_spill]]  ;;  %s1483_s29 = smov %s1157_s30 }
 0x2b6   : > { %s1481_s2 = sld [smem:[#allocation14_spill]] }
 0x2b7   : > { %s1482_s14 = sld [smem:[#allocation16_spill]] }
 0x2bb   : > { %p32_p2 = scmp.ge.s32.totalorder %s1480_s15, 4  }
 0x2bc   : > { %s1484_s30 = smov %s1481_s2 }
 0x2bd   :  { %34 = sbr.rel (!%p32_p2) target bundleno = 10 (0xa), region = 133 }
 0x2c2   :  { %801 = vsyncpa [#allocation5], 1 }
 0x2c3   :  { %803 = vsyncpa [#allocation5 + $0x1], 1 }
 0x2c4   :  { %804 = vsyncpa [#allocation8], 1 }
 0x2c5   :  { %805 = vsyncpa [#allocation6], 1 }
 0x2c6   :  { %807 = vsyncpa [#allocation6 + $0x1], 1 }

// kernel: tpu_custom_call.1
= control target key start
LH: loop header
LB: loop body
LE: loop exit
PB: predicated region body
PF: predicated region fallthrough
CT: control target
= control target key end

     0   :  { %s1446_s0 = inlined_call_operand.hbm [shape: f32[16,32], index: 0, kind: input, shape index: {}]   ;;  %s1447_s1 = inlined_call_operand.<no memory space> [shape: f32[1,1], index: 1, kind: input, shape index: {}]   ;;  %s1448_s2 = inlined_call_operand.hbm [shape: f32[32,32], index: 2, kind: input, shape index: {}]   ;;  %s1449_s3 = inlined_call_operand.vmem [shape: f32[1,32], index: 3, kind: input, shape index: {}]   ;;  %s1450_s4 = inlined_call_operand.vmem [shape: f32[1,16], index: 4, kind: input, shape index: {}]   ;;  %s1451_s5 = inlined_call_operand.vmem [shape: f32[1,16], index: 5, kind: input, shape index: {}]   ;;  %s1452_s6 = inlined_call_operand.hbm [shape: f32[16,32], index: 6, kind: input, shape index: {}]   ;;  %s1453_s7 = inlined_call_operand.vmem [shape: f32[1,32], index: 7, kind: input, shape index: {}]   ;;  %s1454_s8 = inlined_call_operand.vmem [shape: f32[1,32], index: 8, kind: input, shape index: {}]   ;;  %s1455_s9 = inlined_call_operand.vmem [shape: f32[1,32], index: 9, kind: input, shape index: {}]   ;;  %s1456_s10 = inlined_call_operand.vmem [shape: f32[1,16], index: 10, kind: input, shape index: {}]   ;;  %s1457_s12 = inlined_call_operand.hbm [shape: f32[16,32], index: 12, kind: output, shape index: {0}]   ;;  %s1458_s13 = inlined_call_operand.vmem [shape: f32[16,1], index: 13, kind: output, shape index: {1}]   ;;  %s1459_s11 = inlined_call_operand.<no memory space> [shape: f32[1,1], index: 11, kind: input, shape index: {}]  }
   0x1   :  { %1464 = sst [smem:[#allocation18_spill]] %s1448_s2  ;;  %v19_v0 = vstv %s1447_s1  ;;  %v21_v1 = vstv %s1459_s11 }
   0x2   :  { %1465 = sst [smem:[#allocation19_spill]] %s1452_s6  ;;  %20 = vst [vmem:[#allocation2] sm:$0x1] %v19_v0 }
   0x3   :  { %22 = vst [vmem:[#allocation3] sm:$0x1] %v21_v1 }
   0x4   :  { %23 = vsyncpa [#allocation5], 0 }
   0x5   :  { %25 = vsyncpa [#allocation5 + $0x1], 0 }
   0x6   :  { %26 = vsyncpa [#allocation8], 0 }
   0x7   :  { %27 = vsyncpa [#allocation6], 0 }
   0x8   :  { %29 = vsyncpa [#allocation6 + $0x1], 0  ;;  %s1251_s29 = smov 0   ;;  %s1253_s30 = smov 0  }
   0x9   :  { %s1255_s14 = smov 0   ;;  %s1257_s15 = smov 0  }
   0xa LB: > { %1466 = sst [smem:[#allocation14_spill]] %s1161_s14  ;;  %s1275_s17 = sadd.s32 4294967295, %s1165_s15   ;;  %s1165_s15 = sphi %s1257_s15, %s1480_s15   ;;  %s1161_s14 = sphi %s1255_s14, %s1482_s14   ;;  %s1157_s30 = sphi %s1253_s30, %s1484_s30   ;;  %s1153_s29 = sphi %s1251_s29, %s1483_s29  }
   0xb   : > { %s1467_s2 = sld [smem:[#allocation18_spill]]  ;;  %p890_p0 = scmp.ge.s32.totalorder %s1165_s15, 1 }
   0xc   : > { %p56_p1 = scmp.eq.s32.totalorder %s1275_s17, 0  ;;  %p349_p2 = scmp.lt.s32.totalorder %s1165_s15, 3 }
   0xd   : > { %s1167_s19 = smov [#allocation7]   ;;  %s1469_s6 = sld [smem:[#allocation19_spill]] }
   0xe   : > { %p1280_p3 = pnand %p890_p0, %p349_p2  ;;  %s365_s20 = sshll.u32 %s1167_s19, 4  ;;  %s366_s20 = int_to_ptr.vmem [resolvable:$true] %s365_s20 }
   0xf   : > { %s1168_s24 = smov [#allocation9]   ;;  %s1169_s26 = smov 128  }
  0x10   : > { %p921_p4 = pneg %p1280_p3  ;;  %s388_s25 = sshll.u32 %s1168_s24, 4  ;;  %s389_s25 = int_to_ptr.vmem [resolvable:$true] %s388_s25 }
  0x11   : > { %s363_s16 = sshll.u32 %s1467_s2, 4  ;;  %s1170_s27 = smov 8   ;;  %s364_s16 = int_to_ptr.hbm [resolvable:$true] %s363_s16 }
  0x12   : > { %p922_p6 = pnand %p921_p4, %p56_p1  ;;  %s889_s28 = sadd.s32 4294967294, %s1165_s15  }
  0x13   : > { %s386_s23 = sshll.u32 %s1469_s6, 4  ;;  %s1294_s1 = sadd.s32 1, %s1165_s15   ;;  %s387_s23 = int_to_ptr.hbm [resolvable:$true] %s386_s23 }
  0x14   : > { %924 = dma.hbm_to_vmem [thread:$0]  (!%p922_p6), %s364_s16, 512, %s366_s20, [#allocation8], %s1169_s26, %s1169_s26, %s1170_s27  }
  0x15   : > { %927 = dma.hbm_to_vmem [thread:$0]  (!%p922_p6), %s387_s23, 256, %s389_s25, [#allocation8], %s1169_s26, %s1169_s26, %s1170_s27  }
  0x16   : > { %1470 = sst [smem:[#allocation15_spill]] %s1294_s1  ;;  %s39_s11 = ssub.s32 %s1165_s15, %s1294_s1 }
  0x17   : > { %s42_s19 = sadd.s32 1, %s1161_s14  ;;  %p40_p7 = scmp.eq.s32.totalorder %s39_s11, 0 }
  0x18   : > { %p49_p8 = scmp.ne.s32.totalorder %s1161_s14, %s1157_s30  ;;  %p50_p9 = scmp.eq.s32.totalorder %s1165_s15, 0 }
  0x19   : > { %p55_p10 = scmp.ne.s32.totalorder %s1157_s30, %s1153_s29  ;;  %p310_p13 = scmp.eq.s32.totalorder %s1275_s17, 1 }
  0x1a   : > { %s1305_s21 = scalar_select %p40_p7, %s1161_s14, %s42_s19  }
  0x1b   : > { %p1307_p11 = por %p50_p9, %p49_p8  ;;  %p1313_p12 = por %p56_p1, %p55_p10 }
  0x1c   : > { %1471 = sst [smem:[#allocation16_spill]] %s1305_s21  ;;  %p316_p0 = scmp.eq.s32.totalorder %s889_s28, 1 }
  0x1d   : > { %p938_p2 = scmp.lt.s32.totalorder %s1165_s15, 2  ;;  %s417_s20 = sand.u32 1, %s1161_s14  }
  0x1e   : > { %p1320_p4 = por %p310_p13, %p49_p8  ;;  %p1324_p6 = por %p316_p0, %p55_p10 }
  0x1f   : > { %s894_s25 = sshll.u32 %s417_s20, 3  ;;  %s895_s26 = sshll.u32 %s1165_s15, 3 }
  0x20   : > { %s1475_s24 = scalar_select %p1324_p6, 1, 0 }
  0x21   : > { %s425_s19 = scalar_lea.hbm %s1446_s0, %s895_s26  ;;  %s421_s2 = scalar_lea.vmem [#allocation4], %s894_s25 }
  0x22   : > { %1476 = sst [smem:[#allocation17_spill]] %s1475_s24  ;;  %s429_s6 = sshll.u32 %s421_s2, 4  ;;  %s430_s6 = int_to_ptr.vmem [resolvable:$true] %s429_s6 }
  0x23   : > { %s427_s21 = sshll.u32 %s425_s19, 4  ;;  %p1334_p7 = pnand %p938_p2, %p1307_p11  ;;  %s428_s21 = int_to_ptr.hbm [resolvable:$true] %s427_s21 }
  0x24   : > { %s418_s14 = scalar_lea.sflag [#allocation5], %s417_s20  ;;  %s1065_s1 = sshra.s32 %s428_s21, 4  ;;  %s1066_s1 = int_to_ptr.hbm [resolvable:$true] %s1065_s1 }
  0x25   : > { %s1067_s24 = scalar_lea.hbm %s1066_s1, 8  ;;  %p1069_p9 = pneg %p1334_p7 }
  0x26   : > { %p1068_p8 = scmp.ne.s32.totalorder %s1066_s1, %s1067_s24  ;;  %s1072_s26 = scalar_lea.hbm %s1446_s0, 16 }
  0x27   : > { %p1073_p11 = scmp.lt.s32.totalorder %s1066_s1, %s1446_s0  ;;  %p1074_p0 = scmp.lt.s32.totalorder %s1072_s26, %s1067_s24 }
  0x28   : > { %p1070_p10 = pnand %p1069_p9, %p1068_p8 }
  0x29   : > { %p1075_p2 = por %p1074_p0, %p1073_p11 }
  0x2a   : > { %p1071_p13 = pneg %p1070_p10 }
  0x2c   : > { %p1076_p5 = pnand %p1075_p2, %p1071_p13 }
  0x2e   : > { %1079 = shalt.err (!%p1076_p5)
}
  0x2f   : > { %931 = dma.hbm_to_vmem [thread:$0]  (!%p1334_p7), %s428_s21, 128, %s430_s6, %s418_s14  }
  0x30   : > { %438 = sbr.rel (%p1280_p3) target bundleno = 686 (0x2ae), region = 68  ;;  %s1351_s20 = sand.u32 (!%p1280_p3), 1, %s1157_s30  }
  0x31   : > { %s897_s11 = sshll.u32 (!%p1280_p3), %s1351_s20, 3  ;;  %s441_s19 = scalar_lea.sflag (!%p1280_p3), [#allocation5], %s1351_s20 }
  0x32   : > { %s444_s1 = scalar_lea.vmem (!%p1280_p3), [#allocation4], %s897_s11 }
  0x35   : > { %1140 = dma.done.wait (%p1313_p12), %s441_s19, 128  }
  0x36   : > { %1142 = vsyncadd (%p1313_p12), %s441_s19, 4294967168 }
  0x37   : > { %1144 = dma.done.wait (%p56_p1), [#allocation8], 768  }
  0x38   : > { %1146 = vsyncadd (%p56_p1), [#allocation8], 4294966528  ;;  %v510_v2 = vld [vmem:[#allocation7 + $0x18] sm:$0xff]  ;;  %v509_v3 = vld [vmem:[#allocation7 + $0x10] sm:$0xff]  ;;  %s1171_s18 = smov 16   ;;  %vm515_vm0 = vcmask 261120  }
  0x39   : > { %531 = vmatpush.msra.mxu0 %v510_v2  ;;  %v508_v4 = vld [vmem:[#allocation7 + $0x8] sm:$0xff]  ;;  %v507_v5 = vld [vmem:[#allocation7] sm:$0xff]  ;;  %v1368_v7 = vld [vmem:[%s444_s1] sm:$0xff]  ;;  %vm590_vm1 = vcmask 130048   ;;  %s1172_s24 = smov 112   ;;  %p502_p1 = scmp.lt.s32.totalorder %s1275_s17, 1 }
  0x3a   : > { %v984_v6 = vld [vmem:[%s1456_s10] ss:$0 sm:$0xff]  ;;  %v679_v61 = vld [vmem:[#allocation9] sm:$0xff]  ;;  %vm751_vm15 = vcmask 7168   ;;  %s906_s21 = sshll.u32 %s1275_s17, 3  ;;  %s754_s1 = scalar_lea.sflag [#allocation6], %s1351_s20 }
  0x3b   : > { %532 = vmatpush.msra.mxu0 %v509_v3  ;;  %582 = vrot.lane.b32.xlu1 %v984_v6, %s1171_s18  ;;  %v985_v8 = vld [vmem:[%s1449_s3] ss:$0 sm:$0xff]  ;;  %s503_s27 = scalar_select %p502_p1, %s1275_s17, 1 }
  0x3c   : > { %v680_v60 = vld [vmem:[#allocation9 + $0x8] sm:$0xff]  ;;  %s768_s2 = scalar_lea.hbm %s1457_s12, %s906_s21  ;;  %s495_s17 = scalar_lea.vmem [#allocation10], %s897_s11 }
  0x3d   : > { %533 = vmatpush.msra.mxu0 %v508_v4  ;;  %702 = vmatpush.msra.mxu1 %v680_v60  ;;  %v986_v3 = vld [vmem:[%s1450_s4] ss:$0 sm:$0xff]  ;;  %s901_s22 = sshll.u32 %s503_s27, 3  ;;  %s772_s19 = sshll.u32 %s768_s2, 4  ;;  %s773_s19 = int_to_ptr.hbm [resolvable:$true] %s772_s19 }
  0x3e   : > { %v987_v6 = vld [vmem:[%s1451_s5] ss:$0 sm:$0xff]  ;;  %s505_s6 = scalar_lea.vmem %s1458_s13, %s901_s22  ;;  %s770_s22 = sshll.u32 %s495_s17, 4  ;;  %s771_s22 = int_to_ptr.vmem [resolvable:$true] %s770_s22 }
  0x3f   : > { %534 = vmatpush.msra.mxu0 %v507_v5  ;;  %703 = vmatpush.msra.mxu1 %v679_v61  ;;  %s1115_s21 = scalar_lea.hbm %s1457_s12, 16 }
  0x40   : > { %902 = vmatmul.msk.f32.vlgmr.msra.gmra.mxu0 %vm515_vm0, %v1368_v7 }
  0xad   : > { %v583_v47 = vpop.permute.xlu1 %582 }
  0xbd   : > { %v536_v9 = vpop.f32.mrf.mxu0 }
  0xbe   : > { %v1375_v10 = vadd.f32 %v985_v8, %v536_v9 }
  0xc0   : > { %v606_v11 = vsel %vm590_vm1, %v1375_v10, 0.0  ;;  %v540_v12 = vmul.f32 0.70710677, %v1375_v10  ;;  %v609_v14 = vmul.f32 %v1375_v10, %v1375_v10  ;;  %v539_v45 = vmul.f32 0.5, %v1375_v10 }
  0xc1   : > { %607 = vadd.xlane.f32.xlu0 %v606_v11 }
  0xc2   : > { %v541_v13 = vand.u32 2147483647, %v540_v12  ;;  %v610_v17 = vsel %vm590_vm1, %v609_v14, 0.0  ;;  %vm574_vm6 = vcmp.ge.f32.partialorder %v540_v12, 0.0 }
  0xc4   : > { %v542_v15 = vmul.f32 0.3275911, %v541_v13  ;;  %v568_v28 = vsub.f32 0.0, %v541_v13 }
  0xc6   : > { %v543_v16 = vadd.f32 1.0, %v542_v15  ;;  %v569_v31 = vmul.f32 %v568_v28, %v541_v13 }
  0xc8   : > { %993 = vrcp.f32 %v543_v16  ;;  %v555_v21 = vand.u32 2147483648, %v543_v16  ;;  %v553_v23 = vand.u32 2147483647, %v543_v16  ;;  %vm549_vm3 = vweird.f32 %v543_v16 }
  0xc9   : > { %611 = vadd.xlane.f32.xlu0 %v610_v17  ;;  %v570_v34 = vmul.f32 1.442695, %v569_v31 }
  0xca   : > { %v556_v25 = vor.u32 1.1754944e-38, %v555_v21  ;;  %vm554_vm5 = vcmp.eq.f32.partialorder %v553_v23, 8.507059e+37 }
  0xcb   : > { %995 = vpow2.f32 %v570_v34 }
  0xce   : > { %v994_v18 = vpop.eup %993 }
  0xcf   : > { %v545_v19 = vmul.f32 %v994_v18, %v543_v16  ;;  %vm550_vm2 = vweird.f32 %v994_v18 }
  0xd0   : > { %vm551_vm4 = vmor %vm549_vm3, %vm550_vm2 }
  0xd1   : > { %v546_v20 = vsub.f32 1.0, %v545_v19  ;;  %v996_v40 = vpop.eup %995 }
  0xd3   : > { %v547_v22 = vmul.f32 %v994_v18, %v546_v20 }
  0xd5   : > { %v548_v24 = vadd.f32 %v994_v18, %v547_v22 }
  0xd7   : > { %v552_v26 = vsel %vm551_vm4, %v994_v18, %v548_v24 }
  0xd8   : > { %v557_v27 = vsel %vm554_vm5, %v556_v25, %v552_v26 }
  0xd9   : > { %v559_v29 = vmul.f32 1.0614054, %v557_v27 }
  0xdb   : > { %v560_v30 = vadd.f32 -1.4531521, %v559_v29 }
  0xdd   : > { %v561_v32 = vmul.f32 %v560_v30, %v557_v27 }
  0xdf   : > { %v562_v33 = vadd.f32 1.4214138, %v561_v32 }
  0xe1   : > { %v563_v35 = vmul.f32 %v562_v33, %v557_v27 }
  0xe3   : > { %v564_v36 = vadd.f32 -0.28449672, %v563_v35 }
  0xe5   : > { %v565_v37 = vmul.f32 %v564_v36, %v557_v27 }
  0xe7   : > { %v566_v38 = vadd.f32 0.2548296, %v565_v37 }
  0xe9   : > { %v567_v39 = vmul.f32 %v566_v38, %v557_v27 }
  0xeb   : > { %v572_v41 = vmul.f32 %v996_v40, %v567_v39 }
  0xed   : > { %v573_v42 = vsub.f32 1.0, %v572_v41 }
  0xef   : > { %v575_v43 = vsub.f32 0.0, %v573_v42 }
  0xf1   : > { %v576_v44 = vsel %vm574_vm6, %v573_v42, %v575_v43 }
  0xf2   : > { %v577_v46 = vadd.f32 1.0, %v576_v44 }
  0xf4   : > { %v578_v48 = vmul.f32 %v577_v46, %v539_v45  ;;  %v1173_v46 = vmov 0  }
  0xf5   : > { %982 = vset.pattern.permute.xlu1 %v1173_v46  ;;  %983 = vset.pattern.permute.xlu0 %v1173_v46 }
  0xf6   : > { %v585_v49 = vmul.f32 %v583_v47, %v578_v48  ;;  %v988_v47 = vld [vmem:[#allocation3] ss:$0 sm:$0xff]  ;;  %v989_v48 = vld [vmem:[#allocation2] ss:$0 sm:$0xff] }
  0xf8   : > { %587 = vrot.lane.b32.xlu1 %v585_v49, %s1172_s24 }
 0x134   : > { %v608_v50 = vpop.xlane.xlu0 %607 }
 0x135   : > { %v613_v51 = vmul.f32 0.0625, %v608_v50 }
 0x137   : > { %v615_v53 = vmul.f32 %v613_v51, %v613_v51  ;;  %v629_v2 = vsub.f32 %v1375_v10, %v613_v51  ;;  %v1174_v51 = vmov 0.0  }
 0x13c   : > { %v612_v52 = vpop.xlane.xlu0 %611 }
 0x13d   : > { %v614_v54 = vmul.f32 0.0625, %v612_v52 }
 0x13f   : > { %v616_v55 = vsub.f32 %v614_v54, %v615_v53  ;;  %v990_v54 = vld [vmem:[%s1453_s7] ss:$0 sm:$0xff] }
 0x141   : > { %v617_v56 = vmax.f32 %v616_v55, 0.0 }
 0x143   : > { %v618_v57 = vadd.f32 1e-05, %v617_v56 }
 0x145   : > { %997 = vrsqrt.f32 %v618_v57  ;;  %vm625_vm8 = vweird.f32 %v618_v57 }
 0x14b   : > { %v998_v58 = vpop.eup %997 }
 0x14c   : > { %v620_v59 = vmul.f32 %v998_v58, %v618_v57  ;;  %vm626_vm7 = vweird.f32 %v998_v58 }
 0x14d   : > { %vm627_vm9 = vmor %vm625_vm8, %vm626_vm7 }
 0x14e   : > { %v621_v62 = vmul.f32 %v998_v58, %v620_v59 }
 0x150   : > { %v622_v63 = vmul.f32 0.5, %v621_v62 }
 0x152   : > { %v623_v0 = vsub.f32 1.5, %v622_v63 }
 0x154   : > { %v624_v1 = vmul.f32 %v998_v58, %v623_v0 }
 0x156   : > { %v628_v4 = vsel %vm627_vm9, %v998_v58, %v624_v1 }
 0x157   : > { %v630_v5 = vmul.f32 %v629_v2, %v628_v4 }
 0x159   : > { %v634_v8 = vmul.f32 %v986_v3, %v630_v5 }
 0x15b   : > { %v638_v9 = vadd.f32 %v987_v6, %v634_v8 }
 0x15d   : > { %v640_v11 = vmul.f32 0.70710677, %v638_v9  ;;  %v639_v43 = vmul.f32 0.5, %v638_v9 }
 0x15f   : > { %v641_v12 = vand.u32 2147483647, %v640_v11  ;;  %vm674_vm14 = vcmp.ge.f32.partialorder %v640_v11, 0.0 }
 0x161   : > { %v642_v13 = vmul.f32 0.3275911, %v641_v12  ;;  %v668_v26 = vsub.f32 0.0, %v641_v12 }
 0x163   : > { %v643_v14 = vadd.f32 1.0, %v642_v13  ;;  %v669_v29 = vmul.f32 %v668_v26, %v641_v12  ;;  %v991_v13 = vld [vmem:[%s1454_s8] ss:$0 sm:$0xff] }
 0x165   : > { %999 = vrcp.f32 %v643_v14  ;;  %v655_v19 = vand.u32 2147483648, %v643_v14  ;;  %v653_v21 = vand.u32 2147483647, %v643_v14  ;;  %vm649_vm11 = vweird.f32 %v643_v14 }
 0x166   : > { %v670_v32 = vmul.f32 1.442695, %v669_v29 }
 0x167   : > { %v656_v23 = vor.u32 1.1754944e-38, %v655_v19  ;;  %vm654_vm13 = vcmp.eq.f32.partialorder %v653_v21, 8.507059e+37 }
 0x168   : > { %1001 = vpow2.f32 %v670_v32 }
 0x16a   : > { %v588_v15 = vpop.permute.xlu1 %587 }
 0x16b   : > { %v1000_v10 = vpop.eup %999  ;;  %v591_v16 = vsel %vm590_vm1, %v588_v15, 0.0 }
 0x16c   : > { %592 = vadd.xlane.f32.xlu2 %v591_v16  ;;  %v645_v17 = vmul.f32 %v1000_v10, %v643_v14  ;;  %vm650_vm10 = vweird.f32 %v1000_v10 }
 0x16d   : > { %vm651_vm12 = vmor %vm649_vm11, %vm650_vm10 }
 0x16e   : > { %v646_v18 = vsub.f32 1.0, %v645_v17  ;;  %v1002_v38 = vpop.eup %1001 }
 0x170   : > { %v647_v20 = vmul.f32 %v1000_v10, %v646_v18 }
 0x172   : > { %v648_v22 = vadd.f32 %v1000_v10, %v647_v20 }
 0x174   : > { %v652_v24 = vsel %vm651_vm12, %v1000_v10, %v648_v22  ;;  %v992_v10 = vld [vmem:[%s1455_s9] ss:$0 sm:$0xff] }
 0x175   : > { %v657_v25 = vsel %vm654_vm13, %v656_v23, %v652_v24 }
 0x176   : > { %v659_v27 = vmul.f32 1.0614054, %v657_v25 }
 0x178   : > { %v660_v28 = vadd.f32 -1.4531521, %v659_v27 }
 0x17a   : > { %v661_v30 = vmul.f32 %v660_v28, %v657_v25 }
 0x17c   : > { %v662_v31 = vadd.f32 1.4214138, %v661_v30 }
 0x17e   : > { %v663_v33 = vmul.f32 %v662_v31, %v657_v25 }
 0x180   : > { %v664_v34 = vadd.f32 -0.28449672, %v663_v33 }
 0x182   : > { %v665_v35 = vmul.f32 %v664_v34, %v657_v25 }
 0x184   : > { %v666_v36 = vadd.f32 0.2548296, %v665_v35 }
 0x186   : > { %v667_v37 = vmul.f32 %v666_v36, %v657_v25 }
 0x188   : > { %v672_v39 = vmul.f32 %v1002_v38, %v667_v37 }
 0x18a   : > { %v673_v40 = vsub.f32 1.0, %v672_v39 }
 0x18c   : > { %v675_v41 = vsub.f32 0.0, %v673_v40 }
 0x18e   : > { %v676_v42 = vsel %vm674_vm14, %v673_v40, %v675_v41 }
 0x18f   : > { %v677_v44 = vadd.f32 1.0, %v676_v42 }
 0x191   : > { %v678_v45 = vmul.f32 %v677_v44, %v639_v43 }
 0x193   : > { %903 = vmatmul.msk.f32.vlgmr.msra.gmra.mxu1 %vm590_vm1, %v678_v45 }
 0x1df   : > { %v593_v49 = vpop.xlane.xlu2 %592 }
 0x1e0   : > { %v598_v50 = vadd.f32 %v988_v47, %v593_v49 }
 0x1e2   : > { %vm603_vm2 = vcmp.gt.f32.partialorder %v598_v50, %v989_v48 }
 0x1e3   : > { %v904_v52 = vsel %vm603_vm2, 1.0, %v1174_v51  ;;  %v743_v53 = vsel %vm603_vm2, 1, %v1173_v46 }
 0x1e4   : > { %752 = vst.msk [vmem:[%s505_s6] sm:$0xff] %vm751_vm15, %v904_v52  ;;  %745 = vperm.xlu1 %982, %v743_v53   ;;  %s1109_s6 = sshra.s32 %s773_s19, 4  ;;  %s1110_s6 = int_to_ptr.hbm [resolvable:$true] %s1109_s6 }
 0x1e5   : > { %s1111_s14 = scalar_lea.hbm %s1110_s6, 8  ;;  %p1116_p7 = scmp.lt.s32.totalorder %s1110_s6, %s1457_s12 }
 0x1e6   : > { %p1112_p3 = scmp.ne.s32.totalorder %s1110_s6, %s1111_s14  ;;  %p1117_p8 = scmp.lt.s32.totalorder %s1115_s21, %s1111_s14 }
 0x1e8   : > { %p1113_p5 = pnand %p1112_p3, %p1320_p4  ;;  %p1118_p9 = por %p1117_p8, %p1116_p7 }
 0x1ea   : > { %p1114_p12 = pneg %p1113_p5 }
 0x1ec   : > { %p1119_p10 = pnand %p1118_p9, %p1114_p12 }
 0x210   : > { %v705_v55 = vpop.f32.mrf.mxu1 }
 0x211   : > { %v706_v56 = vadd.f32 %v990_v54, %v705_v55 }
 0x213   : > { %v710_v57 = vsel %vm515_vm0, %v706_v56, 0.0  ;;  %v713_v58 = vmul.f32 %v706_v56, %v706_v56 }
 0x214   : > { %711 = vadd.xlane.f32.xlu2 %v710_v57 }
 0x215   : > { %v714_v59 = vsel %vm515_vm0, %v713_v58, 0.0 }
 0x216   : > { %715 = vadd.xlane.f32.xlu0 %v714_v59 }
 0x256   : > { %v746_v16 = vpop.permute.xlu1 %745 }
 0x257   : > { %vm747_vm5 = vcmp.eq.s32.totalorder %v746_v16, 1 }
 0x287   : > { %v712_v60 = vpop.xlane.xlu2 %711 }
 0x288   : > { %v717_v61 = vmul.f32 0.03125, %v712_v60 }
 0x289   : > { %v716_v62 = vpop.xlane.xlu0 %715 }
 0x28a   : > { %v719_v63 = vmul.f32 %v717_v61, %v717_v61  ;;  %v718_v0 = vmul.f32 0.03125, %v716_v62  ;;  %v733_v12 = vsub.f32 %v706_v56, %v717_v61 }
 0x28c   : > { %v720_v1 = vsub.f32 %v718_v0, %v719_v63 }
 0x28e   : > { %v721_v2 = vmax.f32 %v720_v1, 0.0 }
 0x290   : > { %v722_v3 = vadd.f32 1e-05, %v721_v2 }
 0x292   : > { %1003 = vrsqrt.f32 %v722_v3  ;;  %vm729_vm3 = vweird.f32 %v722_v3 }
 0x298   : > { %v1004_v4 = vpop.eup %1003 }
 0x299   : > { %v724_v5 = vmul.f32 %v1004_v4, %v722_v3  ;;  %vm730_vm1 = vweird.f32 %v1004_v4 }
 0x29a   : > { %vm731_vm4 = vmor %vm729_vm3, %vm730_vm1 }
 0x29b   : > { %v725_v6 = vmul.f32 %v1004_v4, %v724_v5 }
 0x29d   : > { %v726_v8 = vmul.f32 0.5, %v725_v6 }
 0x29f   : > { %v727_v9 = vsub.f32 1.5, %v726_v8 }
 0x2a1   : > { %v728_v11 = vmul.f32 %v1004_v4, %v727_v9 }
 0x2a3   : > { %v732_v14 = vsel %vm731_vm4, %v1004_v4, %v728_v11 }
 0x2a4   : > { %v734_v15 = vmul.f32 %v733_v12, %v732_v14 }
 0x2a6   : > { %v738_v17 = vmul.f32 %v991_v13, %v734_v15 }
 0x2a8   : > { %v742_v18 = vadd.f32 %v992_v10, %v738_v17 }
 0x2aa   : > { %v748_v19 = vsel %vm747_vm5, %v1368_v7, %v742_v18 }
 0x2ab   : > { %749 = vst.msk [vmem:[%s495_s17] sm:$0xff] %vm515_vm0, %v748_v19 }
 0x2ac   : > { %1122 = shalt.err (!%p1119_p10)
}
 0x2ad   : > { %919 = dma.vmem_to_hbm [thread:$0]  (%p1320_p4), %s771_s22, 128, %s773_s19, %s754_s1  }
 0x2ae PF: > { %s787_s28 = sand.u32 1, %s1153_s29   ;;  %p1479_p13 = scmp.ge.s32.totalorder %s1165_s15, 2 }
 0x2af   : > { %s788_s25 = scalar_lea.sflag [#allocation6], %s787_s28 }
 0x2b0   : > { %p933_p11 = pnand %p1479_p13, %p1324_p6 }
 0x2b2   : > { %p934_p0 = pneg %p933_p11 }
 0x2b4   : > { %1148 = dma.done.wait (%p934_p0), %s788_s25, 128  }
 0x2b5   : > { %1150 = vsyncadd (%p934_p0), %s788_s25, 4294967168  ;;  %s1480_s15 = sld [smem:[#allocation15_spill]]  ;;  %s1483_s29 = smov %s1157_s30 }
 0x2b6   : > { %s1481_s2 = sld [smem:[#allocation14_spill]] }
 0x2b7   : > { %s1482_s14 = sld [smem:[#allocation16_spill]] }
 0x2bb   : > { %p32_p2 = scmp.ge.s32.totalorder %s1480_s15, 4  }
 0x2bc   : > { %s1484_s30 = smov %s1481_s2 }
 0x2bd   :  { %34 = sbr.rel (!%p32_p2) target bundleno = 10 (0xa), region = 133 }
 0x2c2   :  { %801 = vsyncpa [#allocation5], 1 }
 0x2c3   :  { %803 = vsyncpa [#allocation5 + $0x1], 1 }
 0x2c4   :  { %804 = vsyncpa [#allocation8], 1 }
 0x2c5   :  { %805 = vsyncpa [#allocation6], 1 }
 0x2c6   :  { %807 = vsyncpa [#allocation6 + $0x1], 1 }

</bundles_post_ra>
